<compile_context>
chip_gen: v7x
topology: tpu7x:2x2x1
jax: 0.10.0
libtpu: 0.0.40
codegen_flags: <defaults>
</compile_context>

<pallas_src>
import functools

import jax
import jax.numpy as jnp
from jax import lax
from jax.experimental import pallas as pl
from jax.experimental.pallas import tpu as pltpu


def _comb_attn_kernel(q_ref, k_ref, v_ref, gw_ref, gb_ref, o_ref, *,
                      scale_half, matmul_dtype):
    # q_ref: (tq, H, E)  k_ref: (S, H, E)  v_ref: (S, H, D)
    # gw_ref: (H, E)     gb_ref: (H, 1)    o_ref: (tq, H*D)
    _, H, _ = q_ref.shape
    D = v_ref.shape[-1]

    for h in range(H):                       # H is small & static -> unrolled
        # Slice the refs (static head index): only one head's slab lives in
        # vregs at a time -> register pressure ~O(tq*E + S*max(E, D)).
        qh = q_ref[:, h, :].astype(jnp.float32)           # (tq, E)
        kh = k_ref[:, h, :]                               # (S, E)
        vh = v_ref[:, h, :]                               # (S, D)

        # ---- gate: grouped Conv1d(H, H, kernel_size=E, groups=H) ----------
        # VPU mul + cross-lane reduce + EUP sigmoid; stays off the MXU so the
        # main QK/PV matmul stream has no interleaved N=1 pushes/pops.
        gw_h = gw_ref[h:h + 1, :].astype(jnp.float32)     # (1, E)
        gb_h = gb_ref[h:h + 1, :].astype(jnp.float32)     # (1, 1)
        g = jax.nn.sigmoid(
            jnp.sum(qh * gw_h, axis=-1, keepdims=True) + gb_h)   # (tq, 1)

        # ---- shared scores at HALF temperature ----------------------------
        # Fold temp0/2 into q (a (tq,E)-sized mul, not (tq,S)), then feed the
        # MXU bf16 operands with f32 accumulation.
        qh_s = (qh * scale_half).astype(matmul_dtype)
        x_half = lax.dot_general(qh_s, kh.astype(matmul_dtype),
                                 (((1,), (1,)), ((), ())),
                                 preferred_element_type=jnp.float32)  # (tq,S)

        # One EUP exp serves both sub-attentions:
        #   e1 = exp(x/2 - m)           (attn_1, temperature temp0/2)
        #   e0 = e1*e1 = exp(x - 2m)    (attn_0, temperature temp0)
        m = jnp.max(x_half, axis=-1, keepdims=True)
        e1 = jnp.exp(x_half - m)
        e0 = e1 * e1

        s0 = jnp.sum(e0, axis=-1, keepdims=True)
        s1 = jnp.sum(e1, axis=-1, keepdims=True)
        # EUP approximate reciprocal + one Newton step (keeps f32 accuracy).
        r0 = pl.reciprocal(s0, approx=True)
        r0 = r0 * (2.0 - s0 * r0)
        r1 = pl.reciprocal(s1, approx=True)
        r1 = r1 * (2.0 - s1 * r1)

        # torch.lerp(out_0, out_1, g) folded into the probabilities:
        #   p = (1-g)*e0/s0 + g*e1/s1 = a*e0 + b*e1   (2 mul + 1 add on (tq,S))
        a = (1.0 - g) * r0
        b = g * r1
        p = a * e0 + b * e1                                           # (tq,S)

        oh = lax.dot_general(p.astype(matmul_dtype), vh.astype(matmul_dtype),
                             (((1,), (0,)), ((), ())),
                             preferred_element_type=jnp.float32)      # (tq,D)

        # Per-head direct store into the lane-dense (tq, H*D) output tile.
        # TODO(synk): if real configs have H*D < 128, pad/pack the minor dim
        # to avoid masked partial stores (demo has H*D = 64).
        o_ref[:, h * D:(h + 1) * D] = oh.astype(o_ref.dtype)


def _pick_tq(T):
    """Largest power-of-two query tile (multiple of 8) that divides T."""
    for cand in (512, 256, 128, 64, 32, 16, 8):
        if T % cand == 0:
            return cand
    return T


def combination_attention(query, key, value, gate_w, gate_b,
                          softmax_temp=None, matmul_dtype=jnp.bfloat16):
    """query: (B, T, H, E), key: (B, S, H, E), value: (B, S, H, D).
    gate_w: (H, 1, E) grouped-Conv1d weight, gate_b: (H,) bias.
    matmul_dtype: MXU operand dtype (softmax math stays f32).
    Returns out: (B, T, H, D)."""
    B, T, H, E = query.shape
    S = key.shape[1]
    D = value.shape[-1]

    # TODO(synk): attn_cfg_0 / attn_cfg_1 are hydra configs in the original
    # module; fixed here to two softmax attentions with temps temp0 and temp0/2.
    # TODO(synk): attn_mask / key_padding_mask are not supported in this path.
    temp0 = float(softmax_temp) if softmax_temp is not None else 1.0 / (E ** 0.5)
    scale_half = 0.5 * temp0          # attn_1 temperature; attn_0 via e1*e1

    gw = gate_w.reshape(H, E).astype(jnp.float32)
    gb = gate_b.reshape(H, 1).astype(jnp.float32)

    tq = _pick_tq(T)
    grid = (B, T // tq)

    # VMEM budget sized from the chosen tiles (double-buffered I/O blocks +
    # per-head f32 temporaries), clamped to [32 MiB, 48 MiB] so it fits the
    # v7x 64 MiB physical VMEM with headroom.
    in_sz = jnp.dtype(query.dtype).itemsize
    io_bytes = 2 * ((tq * H * E + S * H * E + S * H * D) * in_sz
                    + tq * H * D * in_sz)
    tmp_bytes = (6 * tq * S + 2 * (tq * E + S * E + S * D)) * 4
    param_bytes = (H * E + H) * 4
    vmem_limit = int(min(max(32 * 1024 * 1024,
                             2 * (io_bytes + tmp_bytes + param_bytes)),
                         48 * 1024 * 1024))

    kernel = functools.partial(_comb_attn_kernel, scale_half=scale_half,
                               matmul_dtype=matmul_dtype)

    out_flat = pl.pallas_call(
        kernel,
        out_shape=jax.ShapeDtypeStruct((B, T, H * D), query.dtype),
        grid_spec=pltpu.PrefetchScalarGridSpec(
            num_scalar_prefetch=0,
            grid=grid,
            in_specs=[
                pl.BlockSpec((None, tq, H, E), lambda b, t: (b, t, 0, 0)),
                # k / v block indices are constant along the T-tile axis, so
                # Pallas skips re-fetching them between consecutive tiles.
                pl.BlockSpec((None, S, H, E), lambda b, t: (b, 0, 0, 0)),
                pl.BlockSpec((None, S, H, D), lambda b, t: (b, 0, 0, 0)),
                # Gate params: constant block index across the whole grid.
                pl.BlockSpec((H, E), lambda b, t: (0, 0)),
                pl.BlockSpec((H, 1), lambda b, t: (0, 0)),
            ],
            out_specs=pl.BlockSpec((None, tq, H * D), lambda b, t: (b, t, 0)),
        ),
        compiler_params=pltpu.CompilerParams(
            dimension_semantics=("parallel", "parallel"),
            vmem_limit_bytes=vmem_limit),
    )(query, key, value, gw, gb)

    # (B, T, H*D) -> (B, T, H, D): contiguous split of the minor dim (free).
    return out_flat.reshape(B, T, H, D)


def _reference(query, key, value, gate_w, gate_b, temp0, matmul_dtype):
    """Pure-JAX reference mirroring the kernel's precision choices."""
    B, T, H, E = query.shape
    q32 = query.astype(jnp.float32)
    qs = (q32 * (0.5 * temp0)).astype(matmul_dtype)
    x_half = jnp.einsum('bthe,bshe->bhts', qs, key.astype(matmul_dtype),
                        preferred_element_type=jnp.float32)
    m = jnp.max(x_half, axis=-1, keepdims=True)
    e1 = jnp.exp(x_half - m)
    e0 = e1 * e1
    p0 = e0 / jnp.sum(e0, axis=-1, keepdims=True)
    p1 = e1 / jnp.sum(e1, axis=-1, keepdims=True)
    g = jax.nn.sigmoid(
        jnp.einsum('bthe,he->bth', q32, gate_w.reshape(H, E).astype(jnp.float32))
        + gate_b.astype(jnp.float32))                       # (B, T, H)
    g = jnp.transpose(g, (0, 2, 1))[..., None]              # (B, H, T, 1)
    p = (1.0 - g) * p0 + g * p1
    out = jnp.einsum('bhts,bshd->bthd', p.astype(matmul_dtype),
                     value.astype(matmul_dtype),
                     preferred_element_type=jnp.float32)
    return out.astype(query.dtype)


if __name__ == "__main__":
    B, T, S, H, E, D = 2, 8, 8, 4, 16, 16

    key_rng = jax.random.PRNGKey(0)
    kq, kk, kv, kw, kb = jax.random.split(key_rng, 5)
    query = jax.random.normal(kq, (B, T, H, E), dtype=jnp.float32)
    key_t = jax.random.normal(kk, (B, S, H, E), dtype=jnp.float32)
    value = jax.random.normal(kv, (B, S, H, D), dtype=jnp.float32)

    # Grouped Conv1d(H, H, kernel_size=E, groups=H): weight (H, 1, E), bias (H,)
    gate_w = 0.1 * jax.random.normal(kw, (H, 1, E), dtype=jnp.float32)
    gate_b = 0.1 * jax.random.normal(kb, (H,), dtype=jnp.float32)

    out = combination_attention(query, key_t, value, gate_w, gate_b)
    out = jax.block_until_ready(out)

    temp0 = 1.0 / (E ** 0.5)
    ref = _reference(query, key_t, value, gate_w, gate_b, temp0, jnp.bfloat16)
    assert out.shape == (B, T, H, D)
    err = jnp.max(jnp.abs(out - ref))
    assert jnp.allclose(out, ref, atol=2e-3, rtol=2e-3), f"max abs err {err}"

    print("KERNEL_OK")
</pallas_src>

<mosaic_0001>
module attributes {stable_mosaic.version = 11 : i64} {
  func.func @_comb_attn_kernel(%arg0: i32, %arg1: i32, %arg2: memref<1x8x4x16xf32, #tpu.memory_space<vmem>>, %arg3: memref<1x8x4x16xf32, #tpu.memory_space<vmem>>, %arg4: memref<1x8x4x16xf32, #tpu.memory_space<vmem>>, %arg5: memref<4x16xf32, #tpu.memory_space<vmem>>, %arg6: memref<4x1xf32, #tpu.memory_space<vmem>>, %arg7: memref<1x8x64xf32, #tpu.memory_space<vmem>>) attributes {dimension_semantics = [#tpu.dimension_semantics<parallel>, #tpu.dimension_semantics<parallel>], iteration_bounds = array<i64: 2, 1>, scalar_prefetch = 0 : i64, scratch_operands = 0 : i64, tpu.core_type = #tpu.core_type<tc>, window_params = [{transform_indices = @transform_0, window_bounds = array<i64: 1, 8, 4, 16>}, {transform_indices = @transform_1, window_bounds = array<i64: 1, 8, 4, 16>}, {transform_indices = @transform_2, window_bounds = array<i64: 1, 8, 4, 16>}, {pipeline_mode = #tpu.pipeline_mode<synchronous>, transform_indices = @transform_3, window_bounds = array<i64: 4, 16>}, {pipeline_mode = #tpu.pipeline_mode<synchronous>, transform_indices = @transform_4, window_bounds = array<i64: 4, 1>}, {transform_indices = @transform_5, window_bounds = array<i64: 1, 8, 64>}]} {
    %c0 = arith.constant 0 : index
    %c0_0 = arith.constant 0 : index
    %c0_1 = arith.constant 0 : index
    %c0_2 = arith.constant 0 : index
    %0 = vector.load %arg2[%c0, %c0_0, %c0_1, %c0_2] : memref<1x8x4x16xf32, #tpu.memory_space<vmem>>, vector<1x8x1x16xf32>
    %1 = vector.shape_cast %0 : vector<1x8x1x16xf32> to vector<8x16xf32>
    %c0_3 = arith.constant 0 : index
    %c0_4 = arith.constant 0 : index
    %c0_5 = arith.constant 0 : index
    %c0_6 = arith.constant 0 : index
    %2 = vector.load %arg3[%c0_3, %c0_4, %c0_5, %c0_6] : memref<1x8x4x16xf32, #tpu.memory_space<vmem>>, vector<1x8x1x16xf32>
    %3 = vector.shape_cast %2 : vector<1x8x1x16xf32> to vector<8x16xf32>
    %c0_7 = arith.constant 0 : index
    %c0_8 = arith.constant 0 : index
    %c0_9 = arith.constant 0 : index
    %c0_10 = arith.constant 0 : index
    %4 = vector.load %arg4[%c0_7, %c0_8, %c0_9, %c0_10] : memref<1x8x4x16xf32, #tpu.memory_space<vmem>>, vector<1x8x1x16xf32>
    %5 = vector.shape_cast %4 : vector<1x8x1x16xf32> to vector<8x16xf32>
    %c0_11 = arith.constant 0 : index
    %c0_12 = arith.constant 0 : index
    %6 = vector.load %arg5[%c0_11, %c0_12] : memref<4x16xf32, #tpu.memory_space<vmem>>, vector<1x16xf32>
    %c0_13 = arith.constant 0 : index
    %c0_14 = arith.constant 0 : index
    %7 = vector.load %arg6[%c0_13, %c0_14] : memref<4x1xf32, #tpu.memory_space<vmem>>, vector<1x1xf32>
    %8 = vector.broadcast %6 : vector<1x16xf32> to vector<8x16xf32>
    %9 = arith.mulf %1, %8 : vector<8x16xf32>
    %cst = arith.constant dense<0.000000e+00> : vector<8xf32>
    %10 = vector.multi_reduction <add>, %9, %cst [1] : vector<8x16xf32> to vector<8xf32>
    %11 = vector.shape_cast %10 : vector<8xf32> to vector<8x1xf32>
    %12 = vector.broadcast %7 : vector<1x1xf32> to vector<8x1xf32>
    %13 = arith.addf %11, %12 : vector<8x1xf32>
    %14 = arith.negf %13 : vector<8x1xf32>
    %15 = math.exp %14 : vector<8x1xf32>
    %cst_15 = arith.constant 1.000000e+00 : f32
    %16 = vector.broadcast %cst_15 : f32 to vector<8x1xf32>
    %17 = arith.addf %16, %15 : vector<8x1xf32>
    %18 = arith.divf %16, %17 : vector<8x1xf32>
    %cst_16 = arith.constant 1.250000e-01 : f32
    %19 = vector.broadcast %cst_16 : f32 to vector<8x16xf32>
    %20 = arith.mulf %1, %19 : vector<8x16xf32>
    %21 = arith.truncf %20 : vector<8x16xf32> to vector<8x16xbf16>
    %22 = arith.truncf %3 : vector<8x16xf32> to vector<8x16xbf16>
    %cst_17 = arith.constant dense<0.000000e+00> : vector<8x8xf32>
    %23 = tpu.matmul %21, %22, %cst_17 {dimension_numbers = #tpu.dot_dimension_numbers<[1], [1], [0], [0], [0, 0, 1, 0], [], []>} : vector<8x16xbf16>, vector<8x16xbf16>, vector<8x8xf32> -> vector<8x8xf32>
    %cst_18 = arith.constant dense<0xFF800000> : vector<8xf32>
    %24 = vector.multi_reduction <maximumf>, %23, %cst_18 [1] : vector<8x8xf32> to vector<8xf32>
    %25 = vector.shape_cast %24 : vector<8xf32> to vector<8x1xf32>
    %26 = vector.broadcast %25 : vector<8x1xf32> to vector<8x8xf32>
    %27 = arith.subf %23, %26 : vector<8x8xf32>
    %28 = math.exp %27 : vector<8x8xf32>
    %29 = arith.mulf %28, %28 : vector<8x8xf32>
    %cst_19 = arith.constant dense<0.000000e+00> : vector<8xf32>
    %30 = vector.multi_reduction <add>, %29, %cst_19 [1] : vector<8x8xf32> to vector<8xf32>
    %31 = vector.shape_cast %30 : vector<8xf32> to vector<8x1xf32>
    %cst_20 = arith.constant dense<0.000000e+00> : vector<8xf32>
    %32 = vector.multi_reduction <add>, %28, %cst_20 [1] : vector<8x8xf32> to vector<8xf32>
    %33 = vector.shape_cast %32 : vector<8xf32> to vector<8x1xf32>
    %34 = tpu.reciprocal %31 {approx = true} : vector<8x1xf32> -> vector<8x1xf32>
    %35 = arith.mulf %31, %34 : vector<8x1xf32>
    %cst_21 = arith.constant 2.000000e+00 : f32
    %36 = vector.broadcast %cst_21 : f32 to vector<8x1xf32>
    %37 = arith.subf %36, %35 : vector<8x1xf32>
    %38 = arith.mulf %34, %37 : vector<8x1xf32>
    %39 = tpu.reciprocal %33 {approx = true} : vector<8x1xf32> -> vector<8x1xf32>
    %40 = arith.mulf %33, %39 : vector<8x1xf32>
    %cst_22 = arith.constant 2.000000e+00 : f32
    %41 = vector.broadcast %cst_22 : f32 to vector<8x1xf32>
    %42 = arith.subf %41, %40 : vector<8x1xf32>
    %43 = arith.mulf %39, %42 : vector<8x1xf32>
    %cst_23 = arith.constant 1.000000e+00 : f32
    %44 = vector.broadcast %cst_23 : f32 to vector<8x1xf32>
    %45 = arith.subf %44, %18 : vector<8x1xf32>
    %46 = arith.mulf %45, %38 : vector<8x1xf32>
    %47 = arith.mulf %18, %43 : vector<8x1xf32>
    %48 = vector.broadcast %46 : vector<8x1xf32> to vector<8x8xf32>
    %49 = arith.mulf %48, %29 : vector<8x8xf32>
    %50 = vector.broadcast %47 : vector<8x1xf32> to vector<8x8xf32>
    %51 = arith.mulf %50, %28 : vector<8x8xf32>
    %52 = arith.addf %49, %51 : vector<8x8xf32>
    %53 = arith.truncf %52 : vector<8x8xf32> to vector<8x8xbf16>
    %54 = arith.truncf %5 : vector<8x16xf32> to vector<8x16xbf16>
    %cst_24 = arith.constant dense<0.000000e+00> : vector<8x16xf32>
    %55 = tpu.matmul %53, %54, %cst_24 {dimension_numbers = #tpu.dot_dimension_numbers<[1], [0], [0], [1], [0, 0, 1, 1], [], []>} : vector<8x8xbf16>, vector<8x16xbf16>, vector<8x16xf32> -> vector<8x16xf32>
    %c0_25 = arith.constant 0 : index
    %c0_26 = arith.constant 0 : index
    %c0_27 = arith.constant 0 : index
    %56 = vector.load %arg7[%c0_25, %c0_26, %c0_27] : memref<1x8x64xf32, #tpu.memory_space<vmem>>, vector<1x8x16xf32>
    %57 = vector.shape_cast %56 : vector<1x8x16xf32> to vector<8x16xf32>
    %58 = vector.shape_cast %55 : vector<8x16xf32> to vector<1x8x16xf32>
    tpu.vector_store %arg7[%c0_25, %c0_26, %c0_27], %58 {strides = array<i32>} : memref<1x8x64xf32, #tpu.memory_space<vmem>>, vector<1x8x16xf32>,
    %c0_28 = arith.constant 0 : index
    %c0_29 = arith.constant 0 : index
    %c1 = arith.constant 1 : index
    %c0_30 = arith.constant 0 : index
    %59 = vector.load %arg2[%c0_28, %c0_29, %c1, %c0_30] : memref<1x8x4x16xf32, #tpu.memory_space<vmem>>, vector<1x8x1x16xf32>
    %60 = vector.shape_cast %59 : vector<1x8x1x16xf32> to vector<8x16xf32>
    %c0_31 = arith.constant 0 : index
    %c0_32 = arith.constant 0 : index
    %c1_33 = arith.constant 1 : index
    %c0_34 = arith.constant 0 : index
    %61 = vector.load %arg3[%c0_31, %c0_32, %c1_33, %c0_34] : memref<1x8x4x16xf32, #tpu.memory_space<vmem>>, vector<1x8x1x16xf32>
    %62 = vector.shape_cast %61 : vector<1x8x1x16xf32> to vector<8x16xf32>
    %c0_35 = arith.constant 0 : index
    %c0_36 = arith.constant 0 : index
    %c1_37 = arith.constant 1 : index
    %c0_38 = arith.constant 0 : index
    %63 = vector.load %arg4[%c0_35, %c0_36, %c1_37, %c0_38] : memref<1x8x4x16xf32, #tpu.memory_space<vmem>>, vector<1x8x1x16xf32>
    %64 = vector.shape_cast %63 : vector<1x8x1x16xf32> to vector<8x16xf32>
    %c1_39 = arith.constant 1 : index
    %c0_40 = arith.constant 0 : index
    %65 = vector.load %arg5[%c1_39, %c0_40] : memref<4x16xf32, #tpu.memory_space<vmem>>, vector<1x16xf32>
    %c1_41 = arith.constant 1 : index
    %c0_42 = arith.constant 0 : index
    %66 = vector.load %arg6[%c1_41, %c0_42] : memref<4x1xf32, #tpu.memory_space<vmem>>, vector<1x1xf32>
    %67 = vector.broadcast %65 : vector<1x16xf32> to vector<8x16xf32>
    %68 = arith.mulf %60, %67 : vector<8x16xf32>
    %cst_43 = arith.constant dense<0.000000e+00> : vector<8xf32>
    %69 = vector.multi_reduction <add>, %68, %cst_43 [1] : vector<8x16xf32> to vector<8xf32>
    %70 = vector.shape_cast %69 : vector<8xf32> to vector<8x1xf32>
    %71 = vector.broadcast %66 : vector<1x1xf32> to vector<8x1xf32>
    %72 = arith.addf %70, %71 : vector<8x1xf32>
    %73 = arith.negf %72 : vector<8x1xf32>
    %74 = math.exp %73 : vector<8x1xf32>
    %cst_44 = arith.constant 1.000000e+00 : f32
    %75 = vector.broadcast %cst_44 : f32 to vector<8x1xf32>
    %76 = arith.addf %75, %74 : vector<8x1xf32>
    %77 = arith.divf %75, %76 : vector<8x1xf32>
    %cst_45 = arith.constant 1.250000e-01 : f32
    %78 = vector.broadcast %cst_45 : f32 to vector<8x16xf32>
    %79 = arith.mulf %60, %78 : vector<8x16xf32>
    %80 = arith.truncf %79 : vector<8x16xf32> to vector<8x16xbf16>
    %81 = arith.truncf %62 : vector<8x16xf32> to vector<8x16xbf16>
    %cst_46 = arith.constant dense<0.000000e+00> : vector<8x8xf32>
    %82 = tpu.matmul %80, %81, %cst_46 {dimension_numbers = #tpu.dot_dimension_numbers<[1], [1], [0], [0], [0, 0, 1, 0], [], []>} : vector<8x16xbf16>, vector<8x16xbf16>, vector<8x8xf32> -> vector<8x8xf32>
    %cst_47 = arith.constant dense<0xFF800000> : vector<8xf32>
    %83 = vector.multi_reduction <maximumf>, %82, %cst_47 [1] : vector<8x8xf32> to vector<8xf32>
    %84 = vector.shape_cast %83 : vector<8xf32> to vector<8x1xf32>
    %85 = vector.broadcast %84 : vector<8x1xf32> to vector<8x8xf32>
    %86 = arith.subf %82, %85 : vector<8x8xf32>
    %87 = math.exp %86 : vector<8x8xf32>
    %88 = arith.mulf %87, %87 : vector<8x8xf32>
    %cst_48 = arith.constant dense<0.000000e+00> : vector<8xf32>
    %89 = vector.multi_reduction <add>, %88, %cst_48 [1] : vector<8x8xf32> to vector<8xf32>
    %90 = vector.shape_cast %89 : vector<8xf32> to vector<8x1xf32>
    %cst_49 = arith.constant dense<0.000000e+00> : vector<8xf32>
    %91 = vector.multi_reduction <add>, %87, %cst_49 [1] : vector<8x8xf32> to vector<8xf32>
    %92 = vector.shape_cast %91 : vector<8xf32> to vector<8x1xf32>
    %93 = tpu.reciprocal %90 {approx = true} : vector<8x1xf32> -> vector<8x1xf32>
    %94 = arith.mulf %90, %93 : vector<8x1xf32>
    %cst_50 = arith.constant 2.000000e+00 : f32
    %95 = vector.broadcast %cst_50 : f32 to vector<8x1xf32>
    %96 = arith.subf %95, %94 : vector<8x1xf32>
    %97 = arith.mulf %93, %96 : vector<8x1xf32>
    %98 = tpu.reciprocal %92 {approx = true} : vector<8x1xf32> -> vector<8x1xf32>
    %99 = arith.mulf %92, %98 : vector<8x1xf32>
    %cst_51 = arith.constant 2.000000e+00 : f32
    %100 = vector.broadcast %cst_51 : f32 to vector<8x1xf32>
    %101 = arith.subf %100, %99 : vector<8x1xf32>
    %102 = arith.mulf %98, %101 : vector<8x1xf32>
    %cst_52 = arith.constant 1.000000e+00 : f32
    %103 = vector.broadcast %cst_52 : f32 to vector<8x1xf32>
    %104 = arith.subf %103, %77 : vector<8x1xf32>
    %105 = arith.mulf %104, %97 : vector<8x1xf32>
    %106 = arith.mulf %77, %102 : vector<8x1xf32>
    %107 = vector.broadcast %105 : vector<8x1xf32> to vector<8x8xf32>
    %108 = arith.mulf %107, %88 : vector<8x8xf32>
    %109 = vector.broadcast %106 : vector<8x1xf32> to vector<8x8xf32>
    %110 = arith.mulf %109, %87 : vector<8x8xf32>
    %111 = arith.addf %108, %110 : vector<8x8xf32>
    %112 = arith.truncf %111 : vector<8x8xf32> to vector<8x8xbf16>
    %113 = arith.truncf %64 : vector<8x16xf32> to vector<8x16xbf16>
    %cst_53 = arith.constant dense<0.000000e+00> : vector<8x16xf32>
    %114 = tpu.matmul %112, %113, %cst_53 {dimension_numbers = #tpu.dot_dimension_numbers<[1], [0], [0], [1], [0, 0, 1, 1], [], []>} : vector<8x8xbf16>, vector<8x16xbf16>, vector<8x16xf32> -> vector<8x16xf32>
    %c0_54 = arith.constant 0 : index
    %c0_55 = arith.constant 0 : index
    %c16 = arith.constant 16 : index
    %115 = vector.load %arg7[%c0_54, %c0_55, %c16] : memref<1x8x64xf32, #tpu.memory_space<vmem>>, vector<1x8x16xf32>
    %116 = vector.shape_cast %115 : vector<1x8x16xf32> to vector<8x16xf32>
    %117 = vector.shape_cast %114 : vector<8x16xf32> to vector<1x8x16xf32>
    tpu.vector_store %arg7[%c0_54, %c0_55, %c16], %117 {strides = array<i32>} : memref<1x8x64xf32, #tpu.memory_space<vmem>>, vector<1x8x16xf32>,
    %c0_56 = arith.constant 0 : index
    %c0_57 = arith.constant 0 : index
    %c2 = arith.constant 2 : index
    %c0_58 = arith.constant 0 : index
    %118 = vector.load %arg2[%c0_56, %c0_57, %c2, %c0_58] : memref<1x8x4x16xf32, #tpu.memory_space<vmem>>, vector<1x8x1x16xf32>
    %119 = vector.shape_cast %118 : vector<1x8x1x16xf32> to vector<8x16xf32>
    %c0_59 = arith.constant 0 : index
    %c0_60 = arith.constant 0 : index
    %c2_61 = arith.constant 2 : index
    %c0_62 = arith.constant 0 : index
    %120 = vector.load %arg3[%c0_59, %c0_60, %c2_61, %c0_62] : memref<1x8x4x16xf32, #tpu.memory_space<vmem>>, vector<1x8x1x16xf32>
    %121 = vector.shape_cast %120 : vector<1x8x1x16xf32> to vector<8x16xf32>
    %c0_63 = arith.constant 0 : index
    %c0_64 = arith.constant 0 : index
    %c2_65 = arith.constant 2 : index
    %c0_66 = arith.constant 0 : index
    %122 = vector.load %arg4[%c0_63, %c0_64, %c2_65, %c0_66] : memref<1x8x4x16xf32, #tpu.memory_space<vmem>>, vector<1x8x1x16xf32>
    %123 = vector.shape_cast %122 : vector<1x8x1x16xf32> to vector<8x16xf32>
    %c2_67 = arith.constant 2 : index
    %c0_68 = arith.constant 0 : index
    %124 = vector.load %arg5[%c2_67, %c0_68] : memref<4x16xf32, #tpu.memory_space<vmem>>, vector<1x16xf32>
    %c2_69 = arith.constant 2 : index
    %c0_70 = arith.constant 0 : index
    %125 = vector.load %arg6[%c2_69, %c0_70] : memref<4x1xf32, #tpu.memory_space<vmem>>, vector<1x1xf32>
    %126 = vector.broadcast %124 : vector<1x16xf32> to vector<8x16xf32>
    %127 = arith.mulf %119, %126 : vector<8x16xf32>
    %cst_71 = arith.constant dense<0.000000e+00> : vector<8xf32>
    %128 = vector.multi_reduction <add>, %127, %cst_71 [1] : vector<8x16xf32> to vector<8xf32>
    %129 = vector.shape_cast %128 : vector<8xf32> to vector<8x1xf32>
    %130 = vector.broadcast %125 : vector<1x1xf32> to vector<8x1xf32>
    %131 = arith.addf %129, %130 : vector<8x1xf32>
    %132 = arith.negf %131 : vector<8x1xf32>
    %133 = math.exp %132 : vector<8x1xf32>
    %cst_72 = arith.constant 1.000000e+00 : f32
    %134 = vector.broadcast %cst_72 : f32 to vector<8x1xf32>
    %135 = arith.addf %134, %133 : vector<8x1xf32>
    %136 = arith.divf %134, %135 : vector<8x1xf32>
    %cst_73 = arith.constant 1.250000e-01 : f32
    %137 = vector.broadcast %cst_73 : f32 to vector<8x16xf32>
    %138 = arith.mulf %119, %137 : vector<8x16xf32>
    %139 = arith.truncf %138 : vector<8x16xf32> to vector<8x16xbf16>
    %140 = arith.truncf %121 : vector<8x16xf32> to vector<8x16xbf16>
    %cst_74 = arith.constant dense<0.000000e+00> : vector<8x8xf32>
    %141 = tpu.matmul %139, %140, %cst_74 {dimension_numbers = #tpu.dot_dimension_numbers<[1], [1], [0], [0], [0, 0, 1, 0], [], []>} : vector<8x16xbf16>, vector<8x16xbf16>, vector<8x8xf32> -> vector<8x8xf32>
    %cst_75 = arith.constant dense<0xFF800000> : vector<8xf32>
    %142 = vector.multi_reduction <maximumf>, %141, %cst_75 [1] : vector<8x8xf32> to vector<8xf32>
    %143 = vector.shape_cast %142 : vector<8xf32> to vector<8x1xf32>
    %144 = vector.broadcast %143 : vector<8x1xf32> to vector<8x8xf32>
    %145 = arith.subf %141, %144 : vector<8x8xf32>
    %146 = math.exp %145 : vector<8x8xf32>
    %147 = arith.mulf %146, %146 : vector<8x8xf32>
    %cst_76 = arith.constant dense<0.000000e+00> : vector<8xf32>
    %148 = vector.multi_reduction <add>, %147, %cst_76 [1] : vector<8x8xf32> to vector<8xf32>
    %149 = vector.shape_cast %148 : vector<8xf32> to vector<8x1xf32>
    %cst_77 = arith.constant dense<0.000000e+00> : vector<8xf32>
    %150 = vector.multi_reduction <add>, %146, %cst_77 [1] : vector<8x8xf32> to vector<8xf32>
    %151 = vector.shape_cast %150 : vector<8xf32> to vector<8x1xf32>
    %152 = tpu.reciprocal %149 {approx = true} : vector<8x1xf32> -> vector<8x1xf32>
    %153 = arith.mulf %149, %152 : vector<8x1xf32>
    %cst_78 = arith.constant 2.000000e+00 : f32
    %154 = vector.broadcast %cst_78 : f32 to vector<8x1xf32>
    %155 = arith.subf %154, %153 : vector<8x1xf32>
    %156 = arith.mulf %152, %155 : vector<8x1xf32>
    %157 = tpu.reciprocal %151 {approx = true} : vector<8x1xf32> -> vector<8x1xf32>
    %158 = arith.mulf %151, %157 : vector<8x1xf32>
    %cst_79 = arith.constant 2.000000e+00 : f32
    %159 = vector.broadcast %cst_79 : f32 to vector<8x1xf32>
    %160 = arith.subf %159, %158 : vector<8x1xf32>
    %161 = arith.mulf %157, %160 : vector<8x1xf32>
    %cst_80 = arith.constant 1.000000e+00 : f32
    %162 = vector.broadcast %cst_80 : f32 to vector<8x1xf32>
    %163 = arith.subf %162, %136 : vector<8x1xf32>
    %164 = arith.mulf %163, %156 : vector<8x1xf32>
    %165 = arith.mulf %136, %161 : vector<8x1xf32>
    %166 = vector.broadcast %164 : vector<8x1xf32> to vector<8x8xf32>
    %167 = arith.mulf %166, %147 : vector<8x8xf32>
    %168 = vector.broadcast %165 : vector<8x1xf32> to vector<8x8xf32>
    %169 = arith.mulf %168, %146 : vector<8x8xf32>
    %170 = arith.addf %167, %169 : vector<8x8xf32>
    %171 = arith.truncf %170 : vector<8x8xf32> to vector<8x8xbf16>
    %172 = arith.truncf %123 : vector<8x16xf32> to vector<8x16xbf16>
    %cst_81 = arith.constant dense<0.000000e+00> : vector<8x16xf32>
    %173 = tpu.matmul %171, %172, %cst_81 {dimension_numbers = #tpu.dot_dimension_numbers<[1], [0], [0], [1], [0, 0, 1, 1], [], []>} : vector<8x8xbf16>, vector<8x16xbf16>, vector<8x16xf32> -> vector<8x16xf32>
    %c0_82 = arith.constant 0 : index
    %c0_83 = arith.constant 0 : index
    %c32 = arith.constant 32 : index
    %174 = vector.load %arg7[%c0_82, %c0_83, %c32] : memref<1x8x64xf32, #tpu.memory_space<vmem>>, vector<1x8x16xf32>
    %175 = vector.shape_cast %174 : vector<1x8x16xf32> to vector<8x16xf32>
    %176 = vector.shape_cast %173 : vector<8x16xf32> to vector<1x8x16xf32>
    tpu.vector_store %arg7[%c0_82, %c0_83, %c32], %176 {strides = array<i32>} : memref<1x8x64xf32, #tpu.memory_space<vmem>>, vector<1x8x16xf32>,
    %c0_84 = arith.constant 0 : index
    %c0_85 = arith.constant 0 : index
    %c3 = arith.constant 3 : index
    %c0_86 = arith.constant 0 : index
    %177 = vector.load %arg2[%c0_84, %c0_85, %c3, %c0_86] : memref<1x8x4x16xf32, #tpu.memory_space<vmem>>, vector<1x8x1x16xf32>
    %178 = vector.shape_cast %177 : vector<1x8x1x16xf32> to vector<8x16xf32>
    %c0_87 = arith.constant 0 : index
    %c0_88 = arith.constant 0 : index
    %c3_89 = arith.constant 3 : index
    %c0_90 = arith.constant 0 : index
    %179 = vector.load %arg3[%c0_87, %c0_88, %c3_89, %c0_90] : memref<1x8x4x16xf32, #tpu.memory_space<vmem>>, vector<1x8x1x16xf32>
    %180 = vector.shape_cast %179 : vector<1x8x1x16xf32> to vector<8x16xf32>
    %c0_91 = arith.constant 0 : index
    %c0_92 = arith.constant 0 : index
    %c3_93 = arith.constant 3 : index
    %c0_94 = arith.constant 0 : index
    %181 = vector.load %arg4[%c0_91, %c0_92, %c3_93, %c0_94] : memref<1x8x4x16xf32, #tpu.memory_space<vmem>>, vector<1x8x1x16xf32>
    %182 = vector.shape_cast %181 : vector<1x8x1x16xf32> to vector<8x16xf32>
    %c3_95 = arith.constant 3 : index
    %c0_96 = arith.constant 0 : index
    %183 = vector.load %arg5[%c3_95, %c0_96] : memref<4x16xf32, #tpu.memory_space<vmem>>, vector<1x16xf32>
    %c3_97 = arith.constant 3 : index
    %c0_98 = arith.constant 0 : index
    %184 = vector.load %arg6[%c3_97, %c0_98] : memref<4x1xf32, #tpu.memory_space<vmem>>, vector<1x1xf32>
    %185 = vector.broadcast %183 : vector<1x16xf32> to vector<8x16xf32>
    %186 = arith.mulf %178, %185 : vector<8x16xf32>
    %cst_99 = arith.constant dense<0.000000e+00> : vector<8xf32>
    %187 = vector.multi_reduction <add>, %186, %cst_99 [1] : vector<8x16xf32> to vector<8xf32>
    %188 = vector.shape_cast %187 : vector<8xf32> to vector<8x1xf32>
    %189 = vector.broadcast %184 : vector<1x1xf32> to vector<8x1xf32>
    %190 = arith.addf %188, %189 : vector<8x1xf32>
    %191 = arith.negf %190 : vector<8x1xf32>
    %192 = math.exp %191 : vector<8x1xf32>
    %cst_100 = arith.constant 1.000000e+00 : f32
    %193 = vector.broadcast %cst_100 : f32 to vector<8x1xf32>
    %194 = arith.addf %193, %192 : vector<8x1xf32>
    %195 = arith.divf %193, %194 : vector<8x1xf32>
    %cst_101 = arith.constant 1.250000e-01 : f32
    %196 = vector.broadcast %cst_101 : f32 to vector<8x16xf32>
    %197 = arith.mulf %178, %196 : vector<8x16xf32>
    %198 = arith.truncf %197 : vector<8x16xf32> to vector<8x16xbf16>
    %199 = arith.truncf %180 : vector<8x16xf32> to vector<8x16xbf16>
    %cst_102 = arith.constant dense<0.000000e+00> : vector<8x8xf32>
    %200 = tpu.matmul %198, %199, %cst_102 {dimension_numbers = #tpu.dot_dimension_numbers<[1], [1], [0], [0], [0, 0, 1, 0], [], []>} : vector<8x16xbf16>, vector<8x16xbf16>, vector<8x8xf32> -> vector<8x8xf32>
    %cst_103 = arith.constant dense<0xFF800000> : vector<8xf32>
    %201 = vector.multi_reduction <maximumf>, %200, %cst_103 [1] : vector<8x8xf32> to vector<8xf32>
    %202 = vector.shape_cast %201 : vector<8xf32> to vector<8x1xf32>
    %203 = vector.broadcast %202 : vector<8x1xf32> to vector<8x8xf32>
    %204 = arith.subf %200, %203 : vector<8x8xf32>
    %205 = math.exp %204 : vector<8x8xf32>
    %206 = arith.mulf %205, %205 : vector<8x8xf32>
    %cst_104 = arith.constant dense<0.000000e+00> : vector<8xf32>
    %207 = vector.multi_reduction <add>, %206, %cst_104 [1] : vector<8x8xf32> to vector<8xf32>
    %208 = vector.shape_cast %207 : vector<8xf32> to vector<8x1xf32>
    %cst_105 = arith.constant dense<0.000000e+00> : vector<8xf32>
    %209 = vector.multi_reduction <add>, %205, %cst_105 [1] : vector<8x8xf32> to vector<8xf32>
    %210 = vector.shape_cast %209 : vector<8xf32> to vector<8x1xf32>
    %211 = tpu.reciprocal %208 {approx = true} : vector<8x1xf32> -> vector<8x1xf32>
    %212 = arith.mulf %208, %211 : vector<8x1xf32>
    %cst_106 = arith.constant 2.000000e+00 : f32
    %213 = vector.broadcast %cst_106 : f32 to vector<8x1xf32>
    %214 = arith.subf %213, %212 : vector<8x1xf32>
    %215 = arith.mulf %211, %214 : vector<8x1xf32>
    %216 = tpu.reciprocal %210 {approx = true} : vector<8x1xf32> -> vector<8x1xf32>
    %217 = arith.mulf %210, %216 : vector<8x1xf32>
    %cst_107 = arith.constant 2.000000e+00 : f32
    %218 = vector.broadcast %cst_107 : f32 to vector<8x1xf32>
    %219 = arith.subf %218, %217 : vector<8x1xf32>
    %220 = arith.mulf %216, %219 : vector<8x1xf32>
    %cst_108 = arith.constant 1.000000e+00 : f32
    %221 = vector.broadcast %cst_108 : f32 to vector<8x1xf32>
    %222 = arith.subf %221, %195 : vector<8x1xf32>
    %223 = arith.mulf %222, %215 : vector<8x1xf32>
    %224 = arith.mulf %195, %220 : vector<8x1xf32>
    %225 = vector.broadcast %223 : vector<8x1xf32> to vector<8x8xf32>
    %226 = arith.mulf %225, %206 : vector<8x8xf32>
    %227 = vector.broadcast %224 : vector<8x1xf32> to vector<8x8xf32>
    %228 = arith.mulf %227, %205 : vector<8x8xf32>
    %229 = arith.addf %226, %228 : vector<8x8xf32>
    %230 = arith.truncf %229 : vector<8x8xf32> to vector<8x8xbf16>
    %231 = arith.truncf %182 : vector<8x16xf32> to vector<8x16xbf16>
    %cst_109 = arith.constant dense<0.000000e+00> : vector<8x16xf32>
    %232 = tpu.matmul %230, %231, %cst_109 {dimension_numbers = #tpu.dot_dimension_numbers<[1], [0], [0], [1], [0, 0, 1, 1], [], []>} : vector<8x8xbf16>, vector<8x16xbf16>, vector<8x16xf32> -> vector<8x16xf32>
    %c0_110 = arith.constant 0 : index
    %c0_111 = arith.constant 0 : index
    %c48 = arith.constant 48 : index
    %233 = vector.load %arg7[%c0_110, %c0_111, %c48] : memref<1x8x64xf32, #tpu.memory_space<vmem>>, vector<1x8x16xf32>
    %234 = vector.shape_cast %233 : vector<1x8x16xf32> to vector<8x16xf32>
    %235 = vector.shape_cast %232 : vector<8x16xf32> to vector<1x8x16xf32>
    tpu.vector_store %arg7[%c0_110, %c0_111, %c48], %235 {strides = array<i32>} : memref<1x8x64xf32, #tpu.memory_space<vmem>>, vector<1x8x16xf32>,
    return
  }
  func.func @transform_0(%arg0: i32, %arg1: i32) -> (i32, i32, i32, i32) {
    %c0_i32 = arith.constant 0 : i32
    %c0_i32_0 = arith.constant 0 : i32
    %c0_i32_1 = arith.constant 0 : i32
    return %arg0, %arg1, %c0_i32, %c0_i32_0 : i32, i32, i32, i32
  }
  func.func @transform_1(%arg0: i32, %arg1: i32) -> (i32, i32, i32, i32) {
    %c0_i32 = arith.constant 0 : i32
    %c0_i32_0 = arith.constant 0 : i32
    %c0_i32_1 = arith.constant 0 : i32
    %c0_i32_2 = arith.constant 0 : i32
    return %arg0, %c0_i32, %c0_i32_0, %c0_i32_1 : i32, i32, i32, i32
  }
  func.func @transform_2(%arg0: i32, %arg1: i32) -> (i32, i32, i32, i32) {
    %c0_i32 = arith.constant 0 : i32
    %c0_i32_0 = arith.constant 0 : i32
    %c0_i32_1 = arith.constant 0 : i32
    %c0_i32_2 = arith.constant 0 : i32
    return %arg0, %c0_i32, %c0_i32_0, %c0_i32_1 : i32, i32, i32, i32
  }
  func.func @transform_3(%arg0: i32, %arg1: i32) -> (i32, i32) {
    %c0_i32 = arith.constant 0 : i32
    %c0_i32_0 = arith.constant 0 : i32
    %c0_i32_1 = arith.constant 0 : i32
    return %c0_i32, %c0_i32_0 : i32, i32
  }
  func.func @transform_4(%arg0: i32, %arg1: i32) -> (i32, i32) {
    %c0_i32 = arith.constant 0 : i32
    %c0_i32_0 = arith.constant 0 : i32
    %c0_i32_1 = arith.constant 0 : i32
    return %c0_i32, %c0_i32_0 : i32, i32
  }
  func.func @transform_5(%arg0: i32, %arg1: i32) -> (i32, i32, i32) {
    %c0_i32 = arith.constant 0 : i32
    %c0_i32_0 = arith.constant 0 : i32
    return %arg0, %arg1, %c0_i32 : i32, i32, i32
  }
}

</mosaic_0001>

<bundles_post_ra>
// kernel: tpu_custom_call.1
= control target key start
LH: loop header
LB: loop body
LE: loop exit
PB: predicated region body
PF: predicated region fallthrough
CT: control target
= control target key end

     0   :  { %s3067_s0 = inlined_call_operand.hbm [shape: f32[2,8,4,16], index: 0, kind: input, shape index: {}]   ;;  %s3068_s1 = inlined_call_operand.hbm [shape: f32[2,8,4,16], index: 1, kind: input, shape index: {}]   ;;  %s3069_s2 = inlined_call_operand.hbm [shape: f32[2,8,4,16], index: 2, kind: input, shape index: {}]   ;;  %s3070_s3 = inlined_call_operand.vmem [shape: f32[4,16], index: 3, kind: input, shape index: {}]   ;;  %s3071_s4 = inlined_call_operand.vmem [shape: f32[4,1], index: 4, kind: input, shape index: {}]   ;;  %s3072_s5 = inlined_call_operand.hbm [shape: f32[2,8,64], index: 5, kind: output, shape index: {}]  }
   0x1   :  { %3085 = sst [smem:[#allocation17_spill]] %s3068_s1 }
   0x2   :  { %10 = vsyncpa [#allocation3], 0 }
   0x3   :  { %12 = vsyncpa [#allocation3 + $0x1], 0 }
   0x4   :  { %13 = vsyncpa [#allocation6], 0 }
   0x5   :  { %15 = vsyncpa [#allocation6 + $0x1], 0 }
   0x6   :  { %16 = vsyncpa [#allocation4], 0 }
   0x7   :  { %18 = vsyncpa [#allocation4 + $0x1], 0  ;;  %s2280_s18 = smov 0   ;;  %s2282_s19 = smov 0  }
   0x8   :  { %s2284_s20 = smov 0   ;;  %s2286_s21 = smov 0  }
   0x9   :  { %s2288_s22 = smov 0   ;;  %s2290_s23 = smov 0  }
   0xa LB: > { %3086 = sst [smem:[#allocation12_spill]] %s2232_s22  ;;  %s2311_s24 = sadd.s32 4294967295, %s2236_s23   ;;  %s2236_s23 = sphi %s2290_s23, %s24_s23   ;;  %s2232_s22 = sphi %s2288_s22, %s3113_s22   ;;  %s2228_s21 = sphi %s2286_s21, %s3112_s21   ;;  %s2224_s20 = sphi %s2284_s20, %s3116_s20   ;;  %s2220_s19 = sphi %s2282_s19, %s3115_s19   ;;  %s2216_s18 = sphi %s2280_s18, %s3114_s18  }
   0xb   : > { %3087 = sst [smem:[#allocation13_spill]] %s2236_s23  ;;  %s1830_s25 = sadd.s32 4294967294, %s2236_s23  }
   0xc   : > { %s36_s26 = sadd.s32 1, %s2232_s22  ;;  %s45_s27 = sadd.s32 1, %s2224_s20 }
   0xd   : > { %p38_p0 = scmp.ge.s32.totalorder %s36_s26, 2  ;;  %p52_p1 = scmp.ne.s32.totalorder %s2224_s20, %s2220_s19 }
   0xe   : > { %p53_p2 = scmp.eq.s32.totalorder %s2236_s23, 0  ;;  %p58_p3 = scmp.ne.s32.totalorder %s2220_s19, %s2216_s18 }
   0xf   : > { %s3118_s26 = smov (%p38_p0, %s36_s26), 0  ;;  %p59_p5 = scmp.eq.s32.totalorder %s2311_s24, 0 }
  0x10   : > { %3088 = sst [smem:[#allocation14_spill]] %s3118_s26  ;;  %p2323_p4 = por %p53_p2, %p52_p1 }
  0x11   : > { %s40_s29 = ssub.s32 %s2232_s22, %s3118_s26  ;;  %p178_p6 = scmp.eq.s32.totalorder %s2311_s24, 1 }
  0x12   : > { %p43_p7 = scmp.eq.s32.totalorder %s40_s29, 0  ;;  %p2331_p8 = por %p59_p5, %p58_p3 }
  0x13   : > { %p2335_p9 = por %p178_p6, %p52_p1  ;;  %p184_p10 = scmp.eq.s32.totalorder %s1830_s25, 1 }
  0x14   : > { %s3090_s30 = scalar_select %p2331_p8, 1, 0 }
  0x15   : > { %s3091_s6 = scalar_select %p2335_p9, 1, 0 }
  0x16   : > { %s2340_s7 = scalar_select %p43_p7, %s2224_s20, %s45_s27  }
  0x17   : > { %p2342_p11 = por %p184_p10, %p58_p3  ;;  %p1960_p13 = scmp.lt.s32.totalorder %s2236_s23, 2 }
  0x18   : > { %3092 = sst [smem:[#allocation15_spill]] %s2340_s7  ;;  %s3073_s9 = sand.u32 1, %s2224_s20  }
  0x19   : > { %s3093_s8 = scalar_select %p2342_p11, 1, 0 }
  0x1a   : > { %s2351_s10 = sshll.u32 %s3073_s9, 5  ;;  %s2354_s11 = sshll.u32 %s2232_s22, 9 }
  0x1b   : > { %3094 = sst [smem:[#allocation16_spill]] %s3093_s8  ;;  %p2358_p0 = pnand %p1960_p13, %p2323_p4 }
  0x1c   : > { %s233_s13 = sand.u32 1, %s2236_s23   ;;  %s3096_s1 = sld [smem:[#allocation17_spill]] }
  0x1d   : > { %s237_s17 = scalar_lea.vmem [#allocation5], %s2351_s10  ;;  %s2374_s27 = scalar_lea.sflag [#allocation6], %s233_s13 }
  0x1e   : > { %s244_s25 = sshll.u32 %s237_s17, 4  ;;  %p2380_p4 = pneg %p2358_p0  ;;  %s2371_s25 = int_to_ptr.vmem [resolvable:$true] %s244_s25 }
  0x22   : > { %s2367_s16 = scalar_lea.hbm %s3096_s1, %s2354_s11  ;;  %s2065_s17 = scalar_lea.hbm %s3096_s1, 1024 }
  0x23   : > { %s2060_s28 = scalar_lea.hbm %s2367_s16, 512  ;;  %p2066_p7 = scmp.lt.u32.totalorder %s2367_s16, %s3096_s1 }
  0x24   : > { %p2061_p3 = scmp.ne.s32.totalorder %s2367_s16, %s2060_s28  ;;  %p2067_p10 = scmp.lt.u32.totalorder %s2065_s17, %s2060_s28 }
  0x25   : > { %p2069_p12 = scmp.lt.u32.totalorder %s2060_s28, %s2367_s16 }
  0x26   : > { %p2063_p5 = pnand %p2380_p4, %p2061_p3  ;;  %p2068_p13 = por %p2067_p10, %p2066_p7 }
  0x28   : > { %p2064_p6 = pneg %p2063_p5  ;;  %p2070_p1 = por %p2069_p12, %p2068_p13 }
  0x2a   : > { %p2071_p2 = pnand %p2070_p1, %p2064_p6 }
  0x2c   : > { %2074 = shalt.err (!%p2071_p2)
}
  0x2d   : > { %s2075_s13 = scalar_lea.vmem %s2371_s25, 512  ;;  %s2238_s14 = smov [#allocation5]  }
  0x2e   : > { %p2076_p3 = scmp.ne.s32.totalorder %s2371_s25, %s2075_s13  ;;  %s2080_s15 = sshll.u32 %s2238_s14, 4  ;;  %s2081_s15 = int_to_ptr.vmem [resolvable:$false] %s2080_s15 }
  0x2f   : > { %s2082_s26 = scalar_lea.vmem %s2081_s15, 1024  ;;  %p2083_p9 = scmp.lt.s32.totalorder %s2371_s25, %s2081_s15 }
  0x30   : > { %p2078_p5 = pnand %p2076_p3, %p2380_p4  ;;  %p2084_p8 = scmp.lt.s32.totalorder %s2082_s26, %s2075_s13 }
  0x32   : > { %p2079_p11 = pneg %p2078_p5  ;;  %p2085_p7 = por %p2084_p8, %p2083_p9 }
  0x34   : > { %p2086_p10 = pnand %p2085_p7, %p2079_p11 }
  0x36   : > { %2089 = shalt.err (!%p2086_p10)
}
  0x37   : > { %s3077_s9 = smov 64   ;;  %s3079_s28 = smov 4  }
  0x38   : > { %1952 = dma.hbm_to_vmem [thread:$0]  (!%p2358_p0), %s2367_s16, 512, %s2371_s25, %s2374_s27, %s3077_s9, %s3077_s9, %s3079_s28  }
  0x39   : > { %p3098_p8 = scmp.lt.s32.totalorder %s2236_s23, 3  ;;  %p3099_p9 = scmp.ge.s32.totalorder %s2236_s23, 1 }
  0x3a   : > { %s2419_s15 = scalar_lea.hbm %s3067_s0, %s2354_s11  ;;  %s214_s26 = scalar_lea.vmem [#allocation2], %s2351_s10 }
  0x3b   : > { %p2411_p11 = pnand %p3099_p9, %p3098_p8  ;;  %s223_s1 = sshll.u32 %s214_s26, 4  ;;  %s2422_s1 = int_to_ptr.vmem [resolvable:$true] %s223_s1 }
  0x3c   : > { %s2428_s9 = scalar_lea.hbm %s3069_s2, %s2354_s11  ;;  %s3101_s28 = sand.u32 1, %s2224_s20  }
  0x3d   : > { %s3100_s17 = scalar_select %p2411_p11, 1, 0 }
  0x3e   : > { %s2432_s22 = scalar_lea.sflag [#allocation3], %s3101_s28  ;;  %s2090_s7 = scalar_lea.hbm %s2419_s15, 512 }
  0x3f   : > { %p2091_p12 = scmp.ne.s32.totalorder %s2419_s15, %s2090_s7  ;;  %s2095_s23 = scalar_lea.hbm %s3067_s0, 1024 }
  0x40   : > { %p2096_p6 = scmp.lt.u32.totalorder %s2419_s15, %s3067_s0  ;;  %p2097_p13 = scmp.lt.u32.totalorder %s2095_s23, %s2090_s7 }
  0x41   : > { %p2093_p1 = pnand %p2091_p12, %p2380_p4  ;;  %p2099_p5 = scmp.lt.u32.totalorder %s2090_s7, %s2419_s15 }
  0x42   : > { %p2098_p3 = por %p2097_p13, %p2096_p6 }
  0x43   : > { %p2094_p2 = pneg %p2093_p1 }
  0x44   : > { %p2100_p7 = por %p2099_p5, %p2098_p3 }
  0x46   : > { %p2101_p10 = pnand %p2100_p7, %p2094_p2 }
  0x48   : > { %2104 = shalt.err (!%p2101_p10)
}
  0x49   : > { %s2105_s11 = scalar_lea.vmem %s2422_s1, 512  ;;  %s2241_s28 = smov [#allocation2]  }
  0x4a   : > { %p2106_p8 = scmp.ne.s32.totalorder %s2422_s1, %s2105_s11  ;;  %s2110_s16 = sshll.u32 %s2241_s28, 4  ;;  %s2111_s16 = int_to_ptr.vmem [resolvable:$false] %s2110_s16 }
  0x4b   : > { %s2112_s8 = scalar_lea.vmem %s2111_s16, 1024  ;;  %p2113_p1 = scmp.lt.s32.totalorder %s2422_s1, %s2111_s16 }
  0x4c   : > { %p2108_p9 = pnand %p2106_p8, %p2380_p4  ;;  %p2114_p11 = scmp.lt.s32.totalorder %s2112_s8, %s2105_s11 }
  0x4e   : > { %p2109_p12 = pneg %p2108_p9  ;;  %p2115_p6 = por %p2114_p11, %p2113_p1 }
  0x50   : > { %p2116_p13 = pnand %p2115_p6, %p2109_p12 }
  0x52   : > { %2119 = shalt.err (!%p2116_p13)
}
  0x53   : > { %s3102_s23 = smov 4   ;;  %s3103_s7 = smov 64  }
  0x54   : > { %1949 = dma.hbm_to_vmem [thread:$0]  (!%p2358_p0), %s2419_s15, 512, %s2422_s1, %s2432_s22, %s3103_s7, %s3103_s7, %s3102_s23  }
  0x55   : > { %s258_s25 = scalar_lea.vmem [#allocation7], %s2351_s10  ;;  %s2120_s14 = scalar_lea.hbm %s2428_s9, 512 }
  0x56   : > { %s265_s13 = sshll.u32 %s258_s25, 4  ;;  %p2121_p11 = scmp.ne.s32.totalorder %s2428_s9, %s2120_s14  ;;  %s2460_s13 = int_to_ptr.vmem [resolvable:$true] %s265_s13 }
  0x57   : > { %s2125_s28 = scalar_lea.hbm %s3069_s2, 1024  ;;  %p2126_p5 = scmp.lt.u32.totalorder %s2428_s9, %s3069_s2 }
  0x58   : > { %p2123_p2 = pnand %p2121_p11, %p2380_p4  ;;  %p2127_p7 = scmp.lt.u32.totalorder %s2125_s28, %s2120_s14 }
  0x59   : > { %p2129_p8 = scmp.lt.u32.totalorder %s2120_s14, %s2428_s9 }
  0x5a   : > { %p2124_p3 = pneg %p2123_p2  ;;  %p2128_p10 = por %p2127_p7, %p2126_p5 }
  0x5c   : > { %p2130_p9 = por %p2129_p8, %p2128_p10 }
  0x5e   : > { %p2131_p12 = pnand %p2130_p9, %p2124_p3 }
  0x60   : > { %2134 = shalt.err (!%p2131_p12)
}
  0x61   : > { %s2135_s1 = scalar_lea.vmem %s2460_s13, 512  ;;  %s2242_s22 = smov [#allocation7]  }
  0x62   : > { %p2136_p1 = scmp.ne.s32.totalorder %s2460_s13, %s2135_s1  ;;  %s2140_s10 = sshll.u32 %s2242_s22, 4  ;;  %s2141_s10 = int_to_ptr.vmem [resolvable:$false] %s2140_s10 }
  0x63   : > { %s2142_s15 = scalar_lea.vmem %s2141_s10, 1024  ;;  %p2143_p11 = scmp.lt.s32.totalorder %s2460_s13, %s2141_s10 }
  0x64   : > { %p2138_p6 = pnand %p2136_p1, %p2380_p4  ;;  %p2144_p2 = scmp.lt.s32.totalorder %s2142_s15, %s2135_s1 }
  0x66   : > { %p2139_p13 = pneg %p2138_p6  ;;  %p2145_p5 = por %p2144_p2, %p2143_p11 }
  0x68   : > { %p2146_p7 = pnand %p2145_p5, %p2139_p13 }
  0x6a   : > { %2149 = shalt.err (!%p2146_p7)
}
  0x6b   : > { %1955 = dma.hbm_to_vmem [thread:$0]  (!%p2358_p0), %s2428_s9, 512, %s2460_s13, %s2374_s27, %s3103_s7, %s3103_s7, %s3102_s23  }
  0x6c   : > { %p3104_p4 = scmp.ne.s32.totalorder %s3100_s17, 0 }
  0x6d   : > { %s2490_s29 = sand.u32 (!%p3104_p4), 1, %s2220_s19   ;;  %p3105_p3 = scmp.ne.s32.totalorder (!%p3104_p4), %s3090_s30, 0 }
  0x6e   : > { %277 = sbr.rel (%p3104_p4) target bundleno = 1857 (0x741), region = 40  ;;  %s2493_s25 = sshll.u32 (!%p3104_p4), %s2490_s29, 5 }
  0x6f   : > { %s280_s12 = scalar_lea.sflag (!%p3104_p4), [#allocation3], %s2490_s29  ;;  %s2497_s14 = scalar_lea.vmem (!%p3104_p4), [#allocation2], %s2493_s25 }
  0x75   : > { %2203 = dma.done.wait (%p3105_p3), %s280_s12, 512  }
  0x76   : > { %2205 = vsyncadd (%p3105_p3), %s280_s12, 4294966784  ;;  %s288_s27 = sand.u32 1, %s2311_s24   ;;  %s2505_s17 = scalar_lea.vmem [#allocation5], %s2493_s25 }
  0x77   : > { %s289_s9 = scalar_lea.sflag [#allocation6], %s288_s27 }
  0x78   : > { %2207 = dma.done.wait (%p3105_p3), %s289_s9, 1024  }
  0x79   : > { %2209 = vsyncadd (%p3105_p3), %s289_s9, 4294966272  ;;  %v2243_v0 = vmov 0.0   ;;  %vm2244_vm0 = vmmov 0   ;;  %vm387_vm1 = vcmask 1041409   ;;  %vm390_vm2 = vcmask 1042434   ;;  %s2610_s13 = scalar_lea.vmem [#allocation7], %s2493_s25 }
  0x7a   : > { %1890 = vmatprep.subr.bf16.mxu0 %v2243_v0  ;;  %1896 = vmatprep.subr.bf16.mxu1 %v2243_v0  ;;  %vm393_vm3 = vcmask 1043459   ;;  %vm396_vm4 = vcmask 1044484   ;;  %v348_v1 = vld [vmem:[%s2505_s17] sm:$0x1]  ;;  %v349_v2 = vld [vmem:[%s2505_s17 + $0x4] sm:$0x1] }
  0x7b   : > { %1892 = vmatprep.mubr.msk.bf16.mxu0 %vm2244_vm0, %v2243_v0  ;;  %1898 = vmatprep.mubr.msk.bf16.mxu1 %vm2244_vm0, %v2243_v0  ;;  %v350_v3 = vld [vmem:[%s2505_s17 + $0x8] sm:$0x1]  ;;  %vm399_vm5 = vcmask 1045509   ;;  %v351_v4 = vld [vmem:[%s2505_s17 + $0xc] sm:$0x1]  ;;  %vm402_vm6 = vcmask 1046534   ;;  %v439_v7 = vpack.c.bf16 %v348_v1, %v348_v1  ;;  %v440_v8 = vpack.c.bf16 %v349_v2, %v349_v2 }
  0x7c   : > { %v352_v5 = vld [vmem:[%s2505_s17 + $0x10] sm:$0x1]  ;;  %v353_v6 = vld [vmem:[%s2505_s17 + $0x14] sm:$0x1]  ;;  %v441_v9 = vpack.c.bf16 %v350_v3, %v350_v3  ;;  %v354_v10 = vld [vmem:[%s2505_s17 + $0x18] sm:$0x1]  ;;  %v442_v12 = vpack.c.bf16 %v351_v4, %v351_v4 }
  0x7d   : > { %v355_v11 = vld [vmem:[%s2505_s17 + $0x1c] sm:$0x1]  ;;  %vm405_vm7 = vcmask 1047559   ;;  %v443_v13 = vpack.c.bf16 %v352_v5, %v352_v5  ;;  %v444_v14 = vpack.c.bf16 %v353_v6, %v353_v6  ;;  %v2526_v15 = vld [vmem:[%s2497_s14] sm:$0x1]  ;;  %v445_v16 = vpack.c.bf16 %v354_v10, %v354_v10  ;;  %s1846_s26 = sshll.u32 %s2490_s29, 3 }
  0x7e   : > { %v446_v17 = vpack.c.bf16 %v355_v11, %v355_v11  ;;  %v486_v18 = vunpack.c.l.b16 %v439_v7  ;;  %v487_v19 = vunpack.c.l.b16 %v440_v8  ;;  %v2529_v20 = vld [vmem:[%s2497_s14 + $0x4] sm:$0x1]  ;;  %v488_v21 = vunpack.c.l.b16 %v441_v9  ;;  %v2532_v25 = vld [vmem:[%s2497_s14 + $0x8] sm:$0x1]  ;;  %v2535_v26 = vld [vmem:[%s2497_s14 + $0xc] sm:$0x1] }
  0x7f   : > { %v489_v22 = vunpack.c.l.b16 %v442_v12  ;;  %v490_v23 = vunpack.c.l.b16 %v443_v13  ;;  %v491_v24 = vunpack.c.l.b16 %v444_v14  ;;  %v2538_v27 = vld [vmem:[%s2497_s14 + $0x10] sm:$0x1]  ;;  %vm408_vm8 = vcmask 130048   ;;  %v2541_v31 = vld [vmem:[%s2497_s14 + $0x14] sm:$0x1]  ;;  %s2832_s11 = scalar_lea.vmem [#allocation8], %s1846_s26 }
  0x80   : > { %v492_v28 = vunpack.c.l.b16 %v445_v16  ;;  %v493_v29 = vunpack.c.l.b16 %v446_v17  ;;  %v494_v30 = vrot.slane %v487_v19, 7  ;;  %v2544_v32 = vld [vmem:[%s2497_s14 + $0x18] sm:$0x1]  ;;  %v423_v33 = vmul.f32 0.125, %v2526_v15  ;;  %v2548_v38 = vld [vmem:[%s2497_s14 + $0x1c] sm:$0x1] }
  0x81   : > { %v496_v34 = vrot.slane %v488_v21, 6  ;;  %v498_v35 = vrot.slane %v489_v22, 5  ;;  %v500_v36 = vrot.slane %v490_v23, 4  ;;  %v502_v37 = vrot.slane %v491_v24, 3  ;;  %s2247_s24 = smov 32   ;;  %s2248_s30 = smov 48  }
  0x82   : > { %v495_v39 = vsel %vm387_vm1, %v494_v30, %v486_v18  ;;  %v504_v40 = vrot.slane %v492_v28, 2  ;;  %v506_v41 = vrot.slane %v493_v29, 1  ;;  %v424_v42 = vmul.f32 0.125, %v2529_v20  ;;  %s1868_s23 = sshll.u32 %s2228_s21, 7  ;;  %s1704_s7 = sshll.u32 %s2832_s11, 4  ;;  %s3019_s7 = int_to_ptr.vmem [resolvable:$true] %s1704_s7 }
  0x83   : > { %v497_v43 = vsel %vm390_vm2, %v496_v34, %v495_v39  ;;  %v425_v44 = vmul.f32 0.125, %v2532_v25  ;;  %v426_v45 = vmul.f32 0.125, %v2535_v26  ;;  %v427_v46 = vmul.f32 0.125, %v2538_v27  ;;  %s3017_s28 = scalar_lea.hbm %s3072_s5, %s1868_s23  ;;  %s1690_s16 = scalar_lea.sflag [#allocation4], %s2490_s29 }
  0x84   : > { %v499_v47 = vsel %vm393_vm3, %v498_v35, %v497_v43  ;;  %v428_v48 = vmul.f32 0.125, %v2541_v31  ;;  %v429_v49 = vmul.f32 0.125, %v2544_v32  ;;  %v430_v50 = vmul.f32 0.125, %v2548_v38  ;;  %s2150_s8 = scalar_lea.vmem %s3019_s7, 128  ;;  %p3106_p10 = scmp.ne.s32.totalorder %s3091_s6, 0 }
  0x85   : > { %v501_v51 = vsel %vm396_vm4, %v500_v36, %v499_v47  ;;  %v431_v52 = vpack.c.bf16 %v423_v33, %v423_v33  ;;  %v432_v53 = vpack.c.bf16 %v424_v42, %v424_v42  ;;  %v433_v54 = vpack.c.bf16 %v425_v44, %v425_v44  ;;  %p2151_p0 = scmp.ne.s32.totalorder %s3019_s7, %s2150_s8  ;;  %s2249_s21 = smov [#allocation8]  }
  0x86   : > { %v503_v55 = vsel %vm399_vm5, %v502_v37, %v501_v51  ;;  %v434_v56 = vpack.c.bf16 %v426_v45, %v426_v45  ;;  %v435_v57 = vpack.c.bf16 %v427_v46, %v427_v46  ;;  %v436_v58 = vpack.c.bf16 %v428_v48, %v428_v48  ;;  %v1847_v37 = vld [vmem:[%s3070_s3] ss:$0 sm:$0xff]  ;;  %s2154_s1 = sshll.u32 %s2249_s21, 4  ;;  %s2155_s1 = int_to_ptr.vmem [resolvable:$false] %s2154_s1 }
  0x87   : > { %v505_v59 = vsel %vm402_vm6, %v504_v40, %v503_v55  ;;  %v437_v60 = vpack.c.bf16 %v429_v49, %v429_v49  ;;  %v438_v61 = vpack.c.bf16 %v430_v50, %v430_v50  ;;  %v455_v62 = vunpack.c.l.b16 %v431_v52  ;;  %p2152_p8 = pnand %p2151_p0, %p3106_p10  ;;  %s2156_s22 = scalar_lea.vmem %s2155_s1, 256 }
  0x88   : > { %v507_v63 = vsel %vm405_vm7, %v506_v41, %v505_v59  ;;  %v456_v1 = vunpack.c.l.b16 %v432_v53  ;;  %v457_v2 = vunpack.c.l.b16 %v433_v54  ;;  %v458_v3 = vunpack.c.l.b16 %v434_v56  ;;  %p2157_p12 = scmp.lt.s32.totalorder %s3019_s7, %s2155_s1  ;;  %p2158_p1 = scmp.lt.s32.totalorder %s2156_s22, %s2150_s8 }
  0x89   : > { %v508_v4 = vpack.c.b16 %v507_v63, %v507_v63  ;;  %v459_v5 = vunpack.c.l.b16 %v435_v57  ;;  %v460_v6 = vunpack.c.l.b16 %v436_v58  ;;  %v461_v7 = vunpack.c.l.b16 %v437_v60  ;;  %p2153_p9 = pneg %p2152_p8 }
  0x8a   : > { %v462_v8 = vunpack.c.l.b16 %v438_v61  ;;  %v463_v9 = vrot.slane %v456_v1, 7  ;;  %v465_v10 = vrot.slane %v457_v2, 6  ;;  %v467_v11 = vrot.slane %v458_v3, 5  ;;  %p2159_p6 = por %p2158_p1, %p2157_p12 }
  0x8b   : > { %v513_v12 = vsel %vm408_vm8, %v508_v4, 0  ;;  %v469_v13 = vrot.slane %v459_v5, 4  ;;  %v471_v16 = vrot.slane %v460_v6, 3  ;;  %v473_v18 = vrot.slane %v461_v7, 2  ;;  %v357_v7 = vld [vmem:[%s2610_s13 + $0x4] sm:$0x1] }
  0x8c   : > { %1891 = vmatpush3.bf16.xpose.msra.mxu0 %v513_v12  ;;  %v464_v14 = vsel %vm387_vm1, %v463_v9, %v455_v62  ;;  %v475_v21 = vrot.slane %v462_v8, 1  ;;  %vm555_vm9 = vcmask 64512   ;;  %v371_v39 = vmul.f32 %v1847_v37, %v2529_v20  ;;  %v1848_v62 = vld [vmem:[%s3071_s4] ss:$0 sm:$0xff]  ;;  %v358_v8 = vld [vmem:[%s2610_s13 + $0x8] sm:$0x1]  ;;  %p2160_p13 = pnand %p2159_p6, %p2153_p9 }
  0x8d   : > { %v466_v17 = vsel %vm390_vm2, %v465_v10, %v464_v14  ;;  %1908 = vmatprep.subr.bf16.mxu0 %v2243_v0  ;;  %v372_v40 = vmul.f32 %v1847_v37, %v2532_v25  ;;  %v370_v41 = vmul.f32 %v1847_v37, %v2526_v15  ;;  %v373_v42 = vmul.f32 %v1847_v37, %v2535_v26  ;;  %v356_v10 = vld [vmem:[%s2610_s13] sm:$0x1] }
  0x8e   : > { %v468_v19 = vsel %vm393_vm3, %v467_v11, %v466_v17  ;;  %v386_v43 = vrot.slane %v371_v39, 7  ;;  %v374_v44 = vmul.f32 %v1847_v37, %v2538_v27  ;;  %v375_v46 = vmul.f32 %v1847_v37, %v2541_v31  ;;  %v359_v11 = vld [vmem:[%s2610_s13 + $0xc] sm:$0x1] }
  0x8f   : > { %v470_v22 = vsel %vm396_vm4, %v469_v13, %v468_v19  ;;  %v389_v45 = vrot.slane %v372_v40, 6  ;;  %v392_v48 = vrot.slane %v373_v42, 5  ;;  %v376_v49 = vmul.f32 %v1847_v37, %v2544_v32  ;;  %v360_v13 = vld [vmem:[%s2610_s13 + $0x10] sm:$0x1] }
  0x90   : > { %v472_v23 = vsel %vm399_vm5, %v471_v16, %v470_v22  ;;  %v388_v47 = vsel %vm387_vm1, %v386_v43, %v370_v41  ;;  %v395_v20 = vrot.slane %v374_v44, 4  ;;  %v377_v25 = vmul.f32 %v1847_v37, %v2548_v38 }
  0x91   : > { %v474_v24 = vsel %vm402_vm6, %v473_v18, %v472_v23  ;;  %v391_v50 = vsel %vm390_vm2, %v389_v45, %v388_v47  ;;  %v398_v51 = vrot.slane %v375_v46, 3  ;;  %v401_v52 = vrot.slane %v376_v49, 2  ;;  %v361_v18 = vld [vmem:[%s2610_s13 + $0x14] sm:$0x1]  ;;  %v362_v23 = vld [vmem:[%s2610_s13 + $0x18] sm:$0x1] }
  0x92   : > { %v476_v28 = vsel %vm405_vm7, %v475_v21, %v474_v24  ;;  %v394_v15 = vsel %vm393_vm3, %v392_v48, %v391_v50  ;;  %v404_v53 = vrot.slane %v377_v25, 1  ;;  %v2245_v61 = vmov 0  }
  0x93   : > { %v477_v29 = vpack.c.b16 %v476_v28, %v476_v28  ;;  %v397_v26 = vsel %vm396_vm4, %v395_v20, %v394_v15  ;;  %2018 = vset.pattern.permute.xlu0 %v2245_v61  ;;  %2019 = vset.pattern.permute.xlu1 %v2245_v61  ;;  %v595_v9 = vpack.c.bf16 %v357_v7, %v357_v7  ;;  %vm636_vm10 = vcmask 1043456   ;;  %v690_v61 = vld [vmem:[%s2505_s17 + $0x5] sm:$0x1] }
  0x94   : > { %v400_v27 = vsel %vm399_vm5, %v398_v51, %v397_v26  ;;  %v596_v12 = vpack.c.bf16 %v358_v8, %v358_v8  ;;  %v594_v14 = vpack.c.bf16 %v356_v10, %v356_v10  ;;  %v597_v16 = vpack.c.bf16 %v359_v11, %v359_v11  ;;  %v694_v11 = vld [vmem:[%s2505_s17 + $0x15] sm:$0x1] }
  0x95   : > { %1893 = vmatmul.mubr.msk.bf16.vlgmr.msra.gmra.mrb[0].mxu0 %vm408_vm8, %v477_v29  ;;  %v403_v31 = vsel %vm402_vm6, %v401_v52, %v400_v27  ;;  %v611_v17 = vunpack.c.l.b16 %v595_v9  ;;  %v598_v19 = vpack.c.bf16 %v360_v13, %v360_v13  ;;  %v599_v24 = vpack.c.bf16 %v361_v18, %v361_v18  ;;  %v2636_v13 = vld [vmem:[%s2497_s14 + $0x5] sm:$0x1] }
  0x96   : > { %1910 = vmatprep.mubr.msk.bf16.mxu0 %vm2244_vm0, %v2243_v0  ;;  %v406_v54 = vsel %vm405_vm7, %v404_v53, %v403_v31  ;;  %v612_v21 = vunpack.c.l.b16 %v596_v12  ;;  %v610_v28 = vunpack.c.l.b16 %v594_v14  ;;  %v613_v29 = vunpack.c.l.b16 %v597_v16 }
  0x97   : > { %v409_v32 = vsel %vm408_vm8, %v406_v54, 0.0  ;;  %v615_v41 = vunpack.c.l.b16 %v599_v24  ;;  %v777_v18 = vpack.c.bf16 %v694_v11, %v694_v11  ;;  %v2645_v24 = vld [vmem:[%s2497_s14 + $0x1] sm:$0x1]  ;;  %vm1015_vm11 = vcmask 261248  }
  0x98   : > { %v620_v37 = vrot.slane %v612_v21, 6  ;;  %v622_v45 = vrot.slane %v613_v29, 5  ;;  %v2641_v21 = vld [vmem:[%s2497_s14 + $0x9] sm:$0x1]  ;;  %vm1351_vm12 = vcmask 392448   ;;  %vm1687_vm13 = vcmask 523648  }
  0x99   : > { %v626_v50 = vrot.slane %v615_v41, 3 }
 0x168   : > { %v549_v30 = vpop.f32.mrb[0].mxu0 }
 0x169   : > { %v1894_v33 = vpop.f32.mrb[1].mxu0  ;;  %v556_v34 = vsel %vm555_vm9, %v549_v30, -inf }
 0x16a   : > { %557 = vmax.xlane.f32.xlu0 %v556_v34  ;;  %v552_v35 = vpop.f32.mrb[2].mxu0  ;;  %v363_v34 = vld [vmem:[%s2610_s13 + $0x1c] sm:$0x1] }
 0x16b   : > { %v1895_v36 = vpop.f32.mrb[3].mxu0  ;;  %v600_v35 = vpack.c.bf16 %v362_v23, %v362_v23  ;;  %v601_v40 = vpack.c.bf16 %v363_v34, %v363_v34  ;;  %v2650_v34 = vld [vmem:[%s2497_s14 + $0xd] sm:$0x1] }
 0x16c   : > { %v614_v36 = vunpack.c.l.b16 %v598_v19 }
 0x16d   : > { %v616_v43 = vunpack.c.l.b16 %v600_v35  ;;  %v617_v49 = vunpack.c.l.b16 %v601_v40  ;;  %v758_v35 = vmul.f32 0.125, %v2641_v21 }
 0x16e   : > { %410 = vadd.xlane.f32.xlu0 %v409_v32  ;;  %v624_v46 = vrot.slane %v614_v36, 4  ;;  %v1026_v36 = vld [vmem:[%s2505_s17 + $0x6] sm:$0x1] }
 0x16f   : > { %v628_v15 = vrot.slane %v616_v43, 2  ;;  %v630_v27 = vrot.slane %v617_v49, 1  ;;  %v766_v49 = vpack.c.bf16 %v758_v35, %v758_v35 }
 0x1f7   : > { %v558_v55 = vpop.xlane.xlu0 %557 }
 0x1f8   : > { %v559_v56 = vsub.f32 %v549_v30, %v558_v55  ;;  %v618_v30 = vrot.slane %v611_v17, 7  ;;  %v695_v17 = vld [vmem:[%s2505_s17 + $0x19] sm:$0x1] }
 0x1fa   : > { %v560_v57 = vmul.f32 1.442695, %v559_v56  ;;  %v619_v42 = vsel %vm387_vm1, %v618_v30, %v610_v28  ;;  %v696_v28 = vld [vmem:[%s2505_s17 + $0x1d] sm:$0x1]  ;;  %v778_v30 = vpack.c.bf16 %v695_v17, %v695_v17 }
 0x1fb   : > { %v411_v63 = vpop.xlane.xlu0 %410  ;;  %v621_v44 = vsel %vm390_vm2, %v620_v37, %v619_v42  ;;  %v824_v37 = vunpack.c.l.b16 %v777_v18  ;;  %v779_v42 = vpack.c.bf16 %v696_v28, %v696_v28 }
 0x1fc   : > { %2020 = vpow2.f32 %v560_v57  ;;  %v416_v1 = vadd.f32 %v1848_v62, %v411_v63  ;;  %v623_v25 = vsel %vm393_vm3, %v622_v45, %v621_v44  ;;  %v691_v62 = vld [vmem:[%s2505_s17 + $0x9] sm:$0x1]  ;;  %v773_v63 = vpack.c.bf16 %v690_v61, %v690_v61  ;;  %v2657_v44 = vld [vmem:[%s2497_s14 + $0x11] sm:$0x1] }
 0x1fd   : > { %v625_v52 = vsel %vm396_vm4, %v624_v46, %v623_v25  ;;  %v759_v45 = vmul.f32 0.125, %v2650_v34  ;;  %v1027_v46 = vld [vmem:[%s2505_s17 + $0xa] sm:$0x1]  ;;  %v2663_v25 = vld [vmem:[%s2497_s14 + $0x15] sm:$0x1] }
 0x1fe   : > { %v1849_v2 = vmul.f32 -1.442695, %v416_v1  ;;  %v627_v53 = vsel %vm399_vm5, %v626_v50, %v625_v52  ;;  %v689_v1 = vld [vmem:[%s2505_s17 + $0x1] sm:$0x1]  ;;  %v1025_v50 = vld [vmem:[%s2505_s17 + $0x2] sm:$0x1] }
 0x1ff   : > { %v629_v32 = vsel %vm402_vm6, %v628_v15, %v627_v53  ;;  %v760_v52 = vmul.f32 0.125, %v2657_v44  ;;  %v1110_v53 = vpack.c.bf16 %v1027_v46, %v1027_v46 }
 0x200   : > { %2022 = vpow2.f32 %v1849_v2  ;;  %v631_v55 = vsel %vm405_vm7, %v630_v27, %v629_v32  ;;  %v692_v2 = vld [vmem:[%s2505_s17 + $0xd] sm:$0x1]  ;;  %v1028_v27 = vld [vmem:[%s2505_s17 + $0xe] sm:$0x1]  ;;  %v767_v32 = vpack.c.bf16 %v759_v45, %v759_v45 }
 0x201   : > { %v632_v57 = vpack.c.b16 %v631_v55, %v631_v55  ;;  %v775_v7 = vpack.c.bf16 %v692_v2, %v692_v2  ;;  %v1108_v55 = vpack.c.bf16 %v1025_v50, %v1025_v50  ;;  %v1111_v2 = vpack.c.bf16 %v1028_v27, %v1028_v27  ;;  %v2693_v27 = vld [vmem:[%s2497_s14 + $0xa] sm:$0x1] }
 0x203   : > { %v822_v14 = vunpack.c.l.b16 %v775_v7 }
 0x205   : > { %v831_v29 = vrot.slane %v822_v14, 5  ;;  %v1030_v14 = vld [vmem:[%s2505_s17 + $0x16] sm:$0x1] }
 0x206   : > { %v2596_v38 = vpop.eup %2020 }
 0x207   : > { %v2600_v58 = vmul.f32 %v2596_v38, %v2596_v38  ;;  %v566_v60 = vsel %vm555_vm9, %v2596_v38, 0.0 }
 0x209   : > { %v563_v59 = vsel %vm555_vm9, %v2600_v58, 0.0 }
 0x20a   : > { %564 = vadd.xlane.f32.xlu1 %v563_v59  ;;  %v2023_v3 = vpop.eup %2022 }
 0x20b   : > { %v420_v4 = vadd.f32 1.0, %v2023_v3  ;;  %v774_v3 = vpack.c.bf16 %v691_v62, %v691_v62 }
 0x20d   : > { %2024 = vrcp.f32 %v420_v4  ;;  %v772_v4 = vpack.c.bf16 %v689_v1, %v689_v1  ;;  %v821_v8 = vunpack.c.l.b16 %v774_v3  ;;  %v1029_v1 = vld [vmem:[%s2505_s17 + $0x12] sm:$0x1]  ;;  %v2675_v3 = vld [vmem:[%s2497_s14 + $0x1d] sm:$0x1] }
 0x20e   : > { %567 = vadd.xlane.f32.xlu1 %v566_v60  ;;  %v638_v60 = vsel %vm636_vm10, %v632_v57, 0  ;;  %v763_v17 = vmul.f32 0.125, %v2675_v3 }
 0x20f   : > { %1897 = vmatpush3.bf16.msra.mxu1 %v638_v60  ;;  %v819_v9 = vunpack.c.l.b16 %v772_v4  ;;  %v829_v16 = vrot.slane %v821_v8, 6  ;;  %v790_v60 = vunpack.c.l.b16 %v766_v49  ;;  %v791_v8 = vunpack.c.l.b16 %v767_v32 }
 0x210   : > { %1902 = vmatprep.subr.bf16.mxu1 %v2243_v0 }
 0x211   : > { %v800_v35 = vrot.slane %v791_v8, 5 }
 0x217   : > { %v2025_v22 = vpop.eup %2024 }
 0x218   : > { %v577_v48 = vsub.f32 1.0, %v2025_v22 }
 0x297   : > { %v565_v5 = vpop.xlane.xlu1 %564 }
 0x298   : > { %2026 = vrcp.f32 %v565_v5 }
 0x29b   : > { %v568_v6 = vpop.xlane.xlu1 %567 }
 0x29c   : > { %2028 = vrcp.f32 %v568_v6 }
 0x2a2   : > { %v2027_v33 = vpop.eup %2026 }
 0x2a3   : > { %v570_v39 = vmul.f32 %v2027_v33, %v565_v5  ;;  %v820_v5 = vunpack.c.l.b16 %v773_v63 }
 0x2a5   : > { %v571_v47 = vsub.f32 2.0, %v570_v39  ;;  %v827_v10 = vrot.slane %v820_v5, 7  ;;  %v756_v39 = vmul.f32 0.125, %v2645_v24  ;;  %v768_v5 = vpack.c.bf16 %v760_v52, %v760_v52 }
 0x2a6   : > { %v2029_v20 = vpop.eup %2028 }
 0x2a7   : > { %v572_v51 = vmul.f32 %v2027_v33, %v571_v47  ;;  %v574_v26 = vmul.f32 %v2029_v20, %v568_v6  ;;  %v693_v6 = vld [vmem:[%s2505_s17 + $0x11] sm:$0x1]  ;;  %v828_v19 = vsel %vm387_vm1, %v827_v10, %v819_v9  ;;  %v1109_v47 = vpack.c.bf16 %v1026_v36, %v1026_v36 }
 0x2a8   : > { %v776_v12 = vpack.c.bf16 %v693_v6, %v693_v6  ;;  %v830_v33 = vsel %vm390_vm2, %v829_v16, %v828_v19  ;;  %v764_v15 = vpack.c.bf16 %v756_v39, %v756_v39  ;;  %v1157_v6 = vunpack.c.l.b16 %v1110_v53 }
 0x2a9   : > { %v575_v31 = vsub.f32 2.0, %v574_v26  ;;  %v578_v54 = vmul.f32 %v577_v48, %v572_v51  ;;  %v832_v43 = vsel %vm393_vm3, %v831_v29, %v830_v33  ;;  %v825_v48 = vunpack.c.l.b16 %v778_v30  ;;  %v1031_v29 = vld [vmem:[%s2505_s17 + $0x1a] sm:$0x1] }
 0x2aa   : > { %v823_v23 = vunpack.c.l.b16 %v776_v12  ;;  %v788_v62 = vunpack.c.l.b16 %v764_v15  ;;  %v1155_v9 = vunpack.c.l.b16 %v1108_v55  ;;  %v798_v12 = vrot.slane %v790_v60, 6  ;;  %v2704_v60 = vld [vmem:[%s2497_s14 + $0xe] sm:$0x1] }
 0x2ab   : > { %v576_v56 = vmul.f32 %v2029_v20, %v575_v31  ;;  %582 = vperm.xlu0 %2018, %v578_v54   ;;  %v835_v20 = vrot.slane %v824_v37, 3  ;;  %v826_v31 = vunpack.c.l.b16 %v779_v42  ;;  %v2669_v54 = vld [vmem:[%s2497_s14 + $0x19] sm:$0x1]  ;;  %v837_v57 = vrot.slane %v825_v48, 2 }
 0x2ac   : > { %v833_v41 = vrot.slane %v823_v23, 4  ;;  %v762_v4 = vmul.f32 0.125, %v2669_v54  ;;  %v1112_v16 = vpack.c.bf16 %v1029_v1, %v1029_v1  ;;  %v792_v28 = vunpack.c.l.b16 %v768_v5  ;;  %v2714_v1 = vld [vmem:[%s2497_s14 + $0x16] sm:$0x1] }
 0x2ad   : > { %v579_v59 = vmul.f32 %v2025_v22, %v576_v56  ;;  %v757_v22 = vmul.f32 0.125, %v2636_v13  ;;  %v1156_v56 = vunpack.c.l.b16 %v1109_v47  ;;  %v839_v7 = vrot.slane %v826_v31, 1  ;;  %v2688_v47 = vld [vmem:[%s2497_s14 + $0x6] sm:$0x1]  ;;  %v1362_v31 = vld [vmem:[%s2505_s17 + $0x7] sm:$0x1] }
 0x2ae   : > { %v834_v26 = vsel %vm396_vm4, %v833_v41, %v832_v43  ;;  %v770_v23 = vpack.c.bf16 %v762_v4, %v762_v4  ;;  %v1165_v30 = vrot.slane %v1157_v6, 6  ;;  %v1113_v36 = vpack.c.bf16 %v1030_v14, %v1030_v14  ;;  %v1032_v43 = vld [vmem:[%s2505_s17 + $0x1e] sm:$0x1]  ;;  %v1363_v6 = vld [vmem:[%s2505_s17 + $0xb] sm:$0x1] }
 0x2af   : > { %588 = vperm.xlu1 %2019, %v579_v59   ;;  %v765_v40 = vpack.c.bf16 %v757_v22, %v757_v22  ;;  %v761_v59 = vmul.f32 0.125, %v2663_v25  ;;  %v836_v61 = vsel %vm399_vm5, %v835_v20, %v834_v26  ;;  %v1163_v10 = vrot.slane %v1156_v56, 7  ;;  %v1361_v14 = vld [vmem:[%s2505_s17 + $0x3] sm:$0x1] }
 0x2b0   : > { %v838_v11 = vsel %vm402_vm6, %v837_v57, %v836_v61  ;;  %v1158_v22 = vunpack.c.l.b16 %v1111_v2  ;;  %v771_v41 = vpack.c.bf16 %v763_v17, %v763_v17  ;;  %v1114_v45 = vpack.c.bf16 %v1031_v29, %v1031_v29 }
 0x2b1   : > { %v789_v51 = vunpack.c.l.b16 %v765_v40  ;;  %v769_v18 = vpack.c.bf16 %v761_v59, %v761_v59  ;;  %v840_v33 = vsel %vm405_vm7, %v839_v7, %v838_v11  ;;  %v1164_v37 = vsel %vm387_vm1, %v1163_v10, %v1155_v9  ;;  %v2701_v59 = vld [vmem:[%s2497_s14 + $0x2] sm:$0x1]  ;;  %v2720_v10 = vld [vmem:[%s2497_s14 + $0x1a] sm:$0x1] }
 0x2b2   : > { %v1159_v40 = vunpack.c.l.b16 %v1112_v16  ;;  %v1167_v46 = vrot.slane %v1158_v22, 5  ;;  %v841_v48 = vpack.c.b16 %v840_v33, %v840_v33  ;;  %v802_v49 = vrot.slane %v792_v28, 4  ;;  %v1364_v22 = vld [vmem:[%s2505_s17 + $0xf] sm:$0x1]  ;;  %v2734_v33 = vld [vmem:[%s2497_s14 + $0x7] sm:$0x1] }
 0x2b3   : > { %v796_v63 = vrot.slane %v789_v51, 7  ;;  %v793_v42 = vunpack.c.l.b16 %v769_v18  ;;  %v1166_v50 = vsel %vm390_vm2, %v1165_v30, %v1164_v37  ;;  %v794_v20 = vunpack.c.l.b16 %v770_v23 }
 0x2b4   : > { %v1160_v51 = vunpack.c.l.b16 %v1113_v36  ;;  %v1115_v26 = vpack.c.bf16 %v1032_v43, %v1032_v43  ;;  %v1169_v52 = vrot.slane %v1159_v40, 4  ;;  %v1093_v53 = vmul.f32 0.125, %v2688_v47 }
 0x2b5   : > { %v797_v19 = vsel %vm387_vm1, %v796_v63, %v788_v62  ;;  %v2697_v32 = vunpack.c.l.b16 %v771_v41  ;;  %v804_v55 = vrot.slane %v793_v42, 3  ;;  %v1161_v56 = vunpack.c.l.b16 %v1114_v45  ;;  %v2711_v63 = vld [vmem:[%s2497_s14 + $0x12] sm:$0x1]  ;;  %v1365_v45 = vld [vmem:[%s2505_s17 + $0x13] sm:$0x1] }
 0x2b6   : > { %v799_v39 = vsel %vm390_vm2, %v798_v12, %v797_v19  ;;  %v1168_v57 = vsel %vm393_vm3, %v1167_v46, %v1166_v50  ;;  %v2707_v61 = vsel %vm408_vm8, %v841_v48, 0  ;;  %v806_v2 = vrot.slane %v794_v20, 2  ;;  %v2727_v19 = vld [vmem:[%s2497_s14 + $0x1e] sm:$0x1]  ;;  %v2748_v50 = vld [vmem:[%s2497_s14 + $0xb] sm:$0x1] }
 0x2b7   : > { %v801_v15 = vsel %vm393_vm3, %v800_v35, %v799_v39  ;;  %v1171_v4 = vrot.slane %v1160_v51, 3  ;;  %v1094_v5 = vmul.f32 0.125, %v2693_v27  ;;  %v1445_v7 = vpack.c.bf16 %v1362_v31, %v1362_v31 }
 0x2b8   : > { %v803_v62 = vsel %vm396_vm4, %v802_v49, %v801_v15  ;;  %v1162_v8 = vunpack.c.l.b16 %v1115_v26  ;;  %v1170_v9 = vsel %vm396_vm4, %v1169_v52, %v1168_v57  ;;  %v1092_v11 = vmul.f32 0.125, %v2701_v59 }
 0x2b9   : > { %v1101_v12 = vpack.c.bf16 %v1093_v53, %v1093_v53  ;;  %v805_v16 = vsel %vm399_vm5, %v804_v55, %v803_v62  ;;  %v808_v17 = vrot.slane %v2697_v32, 1  ;;  %v1173_v18 = vrot.slane %v1161_v56, 2  ;;  %v2753_v53 = vld [vmem:[%s2497_s14 + $0x3] sm:$0x1] }
 0x2ba   : > { %v1095_v23 = vmul.f32 0.125, %v2704_v60  ;;  %v1096_v28 = vmul.f32 0.125, %v2711_v63  ;;  %v1097_v29 = vmul.f32 0.125, %v2714_v1  ;;  %v1446_v30 = vpack.c.bf16 %v1363_v6, %v1363_v6  ;;  %v2757_v6 = vld [vmem:[%s2497_s14 + $0xf] sm:$0x1] }
 0x2bb   : > { %v1172_v35 = vsel %vm399_vm5, %v1171_v4, %v1170_v9  ;;  %v1102_v36 = vpack.c.bf16 %v1094_v5, %v1094_v5  ;;  %v1444_v37 = vpack.c.bf16 %v1361_v14, %v1361_v14  ;;  %v1492_v39 = vunpack.c.l.b16 %v1445_v7  ;;  %v1366_v4 = vld [vmem:[%s2505_s17 + $0x17] sm:$0x1] }
 0x2bc   : > { %v2738_v40 = vsel %vm402_vm6, %v806_v2, %v805_v16  ;;  %v1175_v41 = vrot.slane %v1162_v8, 1  ;;  %v1100_v42 = vpack.c.bf16 %v1092_v11, %v1092_v11  ;;  %v1125_v43 = vunpack.c.l.b16 %v1101_v12 }
 0x2bd   : > { %v2742_v46 = vmul.f32 0.125, %v2720_v10  ;;  %v2745_v48 = vmul.f32 0.125, %v2727_v19  ;;  %v1447_v49 = vpack.c.bf16 %v1364_v22, %v1364_v22  ;;  %v1429_v20 = vmul.f32 0.125, %v2734_v33 }
 0x2be   : > { %v1174_v15 = vsel %vm402_vm6, %v1173_v18, %v1172_v35  ;;  %v1103_v51 = vpack.c.bf16 %v1095_v23, %v1095_v23  ;;  %v1104_v26 = vpack.c.bf16 %v1096_v28, %v1096_v28  ;;  %v1493_v52 = vunpack.c.l.b16 %v1446_v30  ;;  %v1367_v28 = vld [vmem:[%s2505_s17 + $0x1b] sm:$0x1]  ;;  %v2771_v35 = vld [vmem:[%s2497_s14 + $0x13] sm:$0x1] }
 0x2bf   : > { %v1105_v31 = vpack.c.bf16 %v1097_v29, %v1097_v29  ;;  %v1126_v55 = vunpack.c.l.b16 %v1102_v36  ;;  %v1491_v56 = vunpack.c.l.b16 %v1444_v37  ;;  %v1499_v57 = vrot.slane %v1492_v39, 7 }
 0x2c0   : > { %v1124_v62 = vunpack.c.l.b16 %v1100_v42  ;;  %v1132_v2 = vrot.slane %v1125_v43, 7  ;;  %v1448_v5 = vpack.c.bf16 %v1365_v45, %v1365_v45  ;;  %v1430_v7 = vmul.f32 0.125, %v2748_v50 }
 0x2c1   : > { %v1106_v8 = vpack.c.bf16 %v2742_v46, %v2742_v46  ;;  %v1494_v9 = vunpack.c.l.b16 %v1447_v49  ;;  %v1428_v11 = vmul.f32 0.125, %v2753_v53  ;;  %v1437_v12 = vpack.c.bf16 %v1429_v20, %v1429_v20 }
 0x2c2   : > { %v2764_v14 = vsel %vm405_vm7, %v1175_v41, %v1174_v15  ;;  %v1107_v16 = vpack.c.bf16 %v2745_v48, %v2745_v48  ;;  %v1127_v18 = vunpack.c.l.b16 %v1103_v51  ;;  %v1501_v22 = vrot.slane %v1493_v52, 6  ;;  %v1368_v41 = vld [vmem:[%s2505_s17 + $0x1f] sm:$0x1]  ;;  %s2246_s17 = smov 16  }
 0x2c3   : > { %v1134_v23 = vrot.slane %v1126_v55, 6  ;;  %v1449_v29 = vpack.c.bf16 %v1366_v4, %v1366_v4  ;;  %v1500_v30 = vsel %vm387_vm1, %v1499_v57, %v1491_v56  ;;  %v1431_v36 = vmul.f32 0.125, %v2757_v6  ;;  %v2778_v55 = vld [vmem:[%s2497_s14 + $0x17] sm:$0x1] }
 0x2c4   : > { %v1128_v37 = vunpack.c.l.b16 %v1104_v26  ;;  %v1133_v39 = vsel %vm387_vm1, %v1132_v2, %v1124_v62  ;;  %v1495_v42 = vunpack.c.l.b16 %v1448_v5  ;;  %v1438_v43 = vpack.c.bf16 %v1430_v7, %v1430_v7 }
 0x2c5   : > { %v1129_v46 = vunpack.c.l.b16 %v1105_v31  ;;  %v1503_v48 = vrot.slane %v1494_v9, 5  ;;  %v1436_v49 = vpack.c.bf16 %v1428_v11, %v1428_v11  ;;  %v1461_v20 = vunpack.c.l.b16 %v1437_v12  ;;  %v2786_v12 = vld [vmem:[%s2497_s14 + $0x1b] sm:$0x1] }
 0x2c6   : > { %v1136_v15 = vrot.slane %v1127_v18, 5  ;;  %v1450_v51 = vpack.c.bf16 %v1367_v28, %v1367_v28  ;;  %v1502_v52 = vsel %vm390_vm2, %v1501_v22, %v1500_v30  ;;  %v1432_v56 = vmul.f32 0.125, %v2771_v35 }
 0x2c7   : > { %v1135_v57 = vsel %vm390_vm2, %v1134_v23, %v1133_v39  ;;  %v1451_v62 = vpack.c.bf16 %v1368_v41, %v1368_v41  ;;  %v1496_v2 = vunpack.c.l.b16 %v1449_v29  ;;  %v1439_v4 = vpack.c.bf16 %v1431_v36, %v1431_v36 }
 0x2c8   : > { %v1505_v7 = vrot.slane %v1495_v42, 4  ;;  %v1462_v9 = vunpack.c.l.b16 %v1438_v43  ;;  %v1504_v11 = vsel %vm393_vm3, %v1503_v48, %v1502_v52  ;;  %v1433_v18 = vmul.f32 0.125, %v2778_v55 }
 0x2c9   : > { %v1460_v22 = vunpack.c.l.b16 %v1436_v49  ;;  %v1468_v28 = vrot.slane %v1461_v20, 7  ;;  %v1138_v23 = vrot.slane %v1128_v37, 4  ;;  %v1497_v39 = vunpack.c.l.b16 %v1450_v51 }
 0x2ca   : > { %v1440_v29 = vpack.c.bf16 %v1432_v56, %v1432_v56  ;;  %v1130_v36 = vunpack.c.l.b16 %v1106_v8  ;;  %v1507_v41 = vrot.slane %v1496_v2, 3  ;;  %v1506_v43 = vsel %vm396_vm4, %v1505_v7, %v1504_v11 }
 0x2cb   : > { %v1434_v48 = vmul.f32 0.125, %v2786_v12  ;;  %v1470_v52 = vrot.slane %v1462_v9, 6  ;;  %v1498_v49 = vunpack.c.l.b16 %v1451_v62  ;;  %v1441_v20 = vpack.c.bf16 %v1433_v18, %v1433_v18 }
 0x2cc   : > { %v1469_v37 = vsel %vm387_vm1, %v1468_v28, %v1460_v22  ;;  %v809_v8 = vsel %vm405_vm7, %v808_v17, %v2738_v40  ;;  %v1509_v51 = vrot.slane %v1497_v39, 2  ;;  %v1464_v56 = vunpack.c.l.b16 %v1440_v29 }
 0x2cd   : > { %v1177_v32 = vpack.c.b16 %v2764_v14, %v2764_v14  ;;  %v1142_v17 = vrot.slane %v1130_v36, 2  ;;  %v1442_v40 = vpack.c.bf16 %v1434_v48, %v1434_v48  ;;  %v810_v7 = vpack.c.b16 %v809_v8, %v809_v8 }
 0x2ce   : > { %v1474_v9 = vrot.slane %v1464_v56, 4 }
 0x2cf   : > { %v1182_v28 = vsel %vm408_vm8, %v1177_v32, 0 }
 0x32a   : > { %v583_v45 = vpop.permute.xlu0 %582 }
 0x32b   : > { %v585_v31 = vmul.f32 %v583_v45, %v2600_v58  ;;  %v1137_v58 = vsel %vm393_vm3, %v1136_v15, %v1135_v57  ;;  %v2792_v45 = vld [vmem:[%s2497_s14 + $0x1f] sm:$0x1]  ;;  %v1508_v57 = vsel %vm399_vm5, %v1507_v41, %v1506_v43 }
 0x32c   : > { %v1139_v15 = vsel %vm396_vm4, %v1138_v23, %v1137_v58  ;;  %v1435_v62 = vmul.f32 0.125, %v2792_v45 }
 0x32e   : > { %v589_v26 = vpop.permute.xlu1 %588  ;;  %v1443_v18 = vpack.c.bf16 %v1435_v62, %v1435_v62 }
 0x32f   : > { %v591_v5 = vmul.f32 %v2596_v38, %v589_v26  ;;  %v1463_v38 = vunpack.c.l.b16 %v1439_v4  ;;  %v1140_v26 = vrot.slane %v1129_v46, 3  ;;  %v1131_v46 = vunpack.c.l.b16 %v1107_v16 }
 0x330   : > { %v1471_v4 = vsel %vm390_vm2, %v1470_v52, %v1469_v37  ;;  %v1510_v16 = vsel %vm402_vm6, %v1509_v51, %v1508_v57  ;;  %v1467_v58 = vunpack.c.l.b16 %v1443_v18 }
 0x331   : > { %v592_v30 = vadd.f32 %v591_v5, %v585_v31  ;;  %v1472_v2 = vrot.slane %v1463_v38, 5  ;;  %v1511_v31 = vrot.slane %v1498_v49, 1  ;;  %v1465_v5 = vunpack.c.l.b16 %v1441_v20 }
 0x332   : > { %v1144_v11 = vrot.slane %v1131_v46, 1  ;;  %v1480_v48 = vrot.slane %v1467_v58, 1 }
 0x333   : > { %v593_v42 = vpack.c.bf16 %v592_v30, %v592_v30  ;;  %v1473_v22 = vsel %vm393_vm3, %v1472_v2, %v1471_v4  ;;  %v1466_v30 = vunpack.c.l.b16 %v1442_v40  ;;  %v1512_v23 = vsel %vm405_vm7, %v1511_v31, %v1510_v16 }
 0x334   : > { %v1476_v39 = vrot.slane %v1465_v5, 3  ;;  %v1475_v29 = vsel %vm396_vm4, %v1474_v9, %v1473_v22  ;;  %v1513_v41 = vpack.c.b16 %v1512_v23, %v1512_v23 }
 0x335   : > { %1899 = vmatmul.mubr.msk.bf16.vlgmr.msra.gmra.mrb[0].mxu1 %vm555_vm9, %v593_v42  ;;  %v1478_v38 = vrot.slane %v1466_v30, 2 }
 0x336   : > { %1903 = vmatpush3.bf16.xpose.msra.mxu1 %v2707_v61  ;;  %1904 = vmatprep.mubr.msk.bf16.mxu1 %vm2244_vm0, %v2243_v0  ;;  %v1141_v61 = vsel %vm399_vm5, %v1140_v26, %v1139_v15  ;;  %v1477_v42 = vsel %vm399_vm5, %v1476_v39, %v1475_v29  ;;  %v1518_v52 = vsel %vm408_vm8, %v1513_v41, 0 }
 0x337   : > { %1914 = vmatprep.subr.bf16.mxu1 %v2243_v0  ;;  %v1143_v14 = vsel %vm402_vm6, %v1142_v17, %v1141_v61  ;;  %v1479_v26 = vsel %vm402_vm6, %v1478_v38, %v1477_v42  ;;  %v1852_v17 = vld [vmem:[%s3070_s3 + $0x1] ss:$0 sm:$0xff] }
 0x338   : > { %v1145_v36 = vsel %vm405_vm7, %v1144_v11, %v1143_v14  ;;  %v1481_v49 = vsel %vm405_vm7, %v1480_v48, %v1479_v26  ;;  %v712_v61 = vmul.f32 %v1852_v17, %v2636_v13  ;;  %v713_v5 = vmul.f32 %v1852_v17, %v2641_v21 }
 0x339   : > { %v1146_v43 = vpack.c.b16 %v1145_v36, %v1145_v36  ;;  %v1482_v20 = vpack.c.b16 %v1481_v49, %v1481_v49  ;;  %v711_v16 = vmul.f32 %v1852_v17, %v2645_v24  ;;  %v714_v9 = vmul.f32 %v1852_v17, %v2650_v34  ;;  %v1857_v34 = vld [vmem:[%s3070_s3 + $0x2] ss:$0 sm:$0xff] }
 0x33a   : > { %v727_v11 = vrot.slane %v712_v61, 7  ;;  %v715_v18 = vmul.f32 %v1852_v17, %v2657_v44  ;;  %v729_v22 = vrot.slane %v713_v5, 6  ;;  %v717_v13 = vmul.f32 %v1852_v17, %v2669_v54 }
 0x33b   : > { %v731_v30 = vrot.slane %v714_v9, 5  ;;  %v718_v21 = vmul.f32 %v1852_v17, %v2675_v3  ;;  %v1048_v58 = vmul.f32 %v1857_v34, %v2688_v47  ;;  %v1049_v42 = vmul.f32 %v1857_v34, %v2693_v27 }
 0x33c   : > { %v728_v14 = vsel %vm387_vm1, %v727_v11, %v711_v16  ;;  %v733_v39 = vrot.slane %v715_v18, 4  ;;  %v737_v36 = vrot.slane %v717_v13, 2  ;;  %v1050_v26 = vmul.f32 %v1857_v34, %v2704_v60 }
 0x33d   : > { %1905 = vmatmul.mubr.msk.bf16.vlgmr.msra.gmra.mrb[4].mxu1 %vm408_vm8, %v810_v7  ;;  %v730_v23 = vsel %vm390_vm2, %v729_v22, %v728_v14  ;;  %v739_v38 = vrot.slane %v718_v21, 1  ;;  %v1063_v49 = vrot.slane %v1048_v58, 7  ;;  %v1054_v60 = vmul.f32 %v1857_v34, %v2727_v19  ;;  %v1862_v19 = vld [vmem:[%s3070_s3 + $0x3] ss:$0 sm:$0xff] }
 0x33e   : > { %1915 = vmatpush3.bf16.xpose.msra.mxu1 %v1182_v28  ;;  %1916 = vmatprep.mubr.msk.bf16.mxu1 %vm2244_vm0, %v2243_v0  ;;  %v716_v28 = vmul.f32 %v1852_v17, %v2663_v25  ;;  %v732_v24 = vsel %vm393_vm3, %v731_v30, %v730_v23  ;;  %v1384_v5 = vmul.f32 %v1862_v19, %v2734_v33 }
 0x33f   : > { %1926 = vmatprep.subr.bf16.mxu1 %v2243_v0  ;;  %v734_v25 = vsel %vm396_vm4, %v733_v39, %v732_v24  ;;  %v1383_v16 = vmul.f32 %v1862_v19, %v2753_v53  ;;  %v1386_v11 = vmul.f32 %v1862_v19, %v2757_v6  ;;  %v1387_v30 = vmul.f32 %v1862_v19, %v2771_v35 }
 0x340   : > { %v735_v29 = vrot.slane %v716_v28, 3  ;;  %v1399_v9 = vrot.slane %v1384_v5, 7  ;;  %v1388_v33 = vmul.f32 %v1862_v19, %v2778_v55  ;;  %v1389_v6 = vmul.f32 %v1862_v19, %v2786_v12 }
 0x341   : > { %v1403_v23 = vrot.slane %v1386_v11, 5  ;;  %v1390_v35 = vmul.f32 %v1862_v19, %v2792_v45  ;;  %v699_v11 = vld [vmem:[%s2610_s13 + $0x9] sm:$0x1] }
 0x342   : > { %v736_v3 = vsel %vm399_vm5, %v735_v29, %v734_v25  ;;  %v1400_v14 = vsel %vm387_vm1, %v1399_v9, %v1383_v16  ;;  %v1409_v25 = vrot.slane %v1389_v6, 2 }
 0x343   : > { %v738_v48 = vsel %vm402_vm6, %v737_v36, %v736_v3  ;;  %v1411_v55 = vrot.slane %v1390_v35, 1 }
 0x344   : > { %v740_v47 = vsel %vm405_vm7, %v739_v38, %v738_v48 }
 0x345   : > { %1917 = vmatmul.mubr.msk.bf16.vlgmr.msra.gmra.mrb[8].mxu1 %vm408_vm8, %v1146_v43 }
 0x346   : > { %1927 = vmatpush3.bf16.xpose.msra.mxu1 %v1518_v52  ;;  %1928 = vmatprep.mubr.msk.bf16.mxu1 %vm2244_vm0, %v2243_v0  ;;  %v1047_v52 = vmul.f32 %v1857_v34, %v2701_v59 }
 0x348   : > { %v1064_v27 = vsel %vm387_vm1, %v1063_v49, %v1047_v52 }
 0x34d   : > { %1929 = vmatmul.mubr.msk.bf16.vlgmr.msra.gmra.mrb[12].mxu1 %vm408_vm8, %v1482_v20 }
 0x408   : > { %v674_v37 = vpop.f32.mrb[0].mxu1 }
 0x409   : > { %680 = vst.msk [vmem:[%s2832_s11] sm:$0xff] %vm408_vm8, %v674_v37  ;;  %v1900_v8 = vpop.f32.mrb[1].mxu1  ;;  %v1051_v37 = vmul.f32 %v1857_v34, %v2711_v63 }
 0x40a   : > { %v677_v15 = vpop.f32.mrb[2].mxu1  ;;  %v1065_v8 = vrot.slane %v1049_v42, 6 }
 0x40b   : > { %v1901_v51 = vpop.f32.mrb[3].mxu1  ;;  %v742_v15 = vsel %vm408_vm8, %v740_v47, 0.0 }
 0x40c   : > { %v1052_v51 = vmul.f32 %v1857_v34, %v2714_v1  ;;  %v1066_v59 = vsel %vm390_vm2, %v1065_v8, %v1064_v27  ;;  %v1075_v1 = vrot.slane %v1054_v60, 1  ;;  %v1853_v8 = vld [vmem:[%s3071_s4 + $0x1] ss:$0 sm:$0xff]  ;;  %v1858_v27 = vld [vmem:[%s3071_s4 + $0x2] ss:$0 sm:$0xff] }
 0x40e   : > { %v1071_v17 = vrot.slane %v1052_v51, 3 }
 0x410   : > { %v2836_v56 = vpop.f32.mrb[4].mxu1 }
 0x411   : > { %v1906_v46 = vpop.f32.mrb[5].mxu1  ;;  %v888_v57 = vsel %vm555_vm9, %v2836_v56, -inf }
 0x412   : > { %889 = vmax.xlane.f32.xlu1 %v888_v57  ;;  %v885_v62 = vpop.f32.mrb[6].mxu1  ;;  %v1067_v46 = vrot.slane %v1050_v26, 5  ;;  %v1053_v57 = vmul.f32 %v1857_v34, %v2720_v10 }
 0x413   : > { %v1907_v2 = vpop.f32.mrb[7].mxu1  ;;  %v1069_v62 = vrot.slane %v1051_v37, 4 }
 0x414   : > { %v1068_v2 = vsel %vm393_vm3, %v1067_v46, %v1066_v59 }
 0x415   : > { %v1070_v63 = vsel %vm396_vm4, %v1069_v62, %v1068_v2 }
 0x418   : > { %v2840_v32 = vpop.f32.mrb[8].mxu1 }
 0x419   : > { %v1918_v40 = vpop.f32.mrb[9].mxu1  ;;  %v1224_v4 = vsel %vm555_vm9, %v2840_v32, -inf }
 0x41a   : > { %1225 = vmax.xlane.f32.xlu0 %v1224_v4  ;;  %v1221_v31 = vpop.f32.mrb[10].mxu1  ;;  %v1073_v40 = vrot.slane %v1053_v57, 2  ;;  %v1072_v4 = vsel %vm399_vm5, %v1071_v17, %v1070_v63 }
 0x41b   : > { %v1919_v7 = vpop.f32.mrb[11].mxu1 }
 0x41c   : > { %v1074_v61 = vsel %vm402_vm6, %v1073_v40, %v1072_v4  ;;  %v1385_v7 = vmul.f32 %v1862_v19, %v2748_v50  ;;  %v1405_v50 = vrot.slane %v1387_v30, 4 }
 0x41d   : > { %v1076_v31 = vsel %vm405_vm7, %v1075_v1, %v1074_v61  ;;  %v1863_v1 = vld [vmem:[%s3071_s4 + $0x3] ss:$0 sm:$0xff] }
 0x41e   : > { %v1078_v10 = vsel %vm408_vm8, %v1076_v31, 0.0  ;;  %v1401_v22 = vrot.slane %v1385_v7, 6  ;;  %v698_v7 = vld [vmem:[%s2610_s13 + $0x5] sm:$0x1] }
 0x420   : > { %v2861_v44 = vpop.f32.mrb[12].mxu1  ;;  %v1402_v39 = vsel %vm390_vm2, %v1401_v22, %v1400_v14  ;;  %v697_v22 = vld [vmem:[%s2610_s13 + $0x1] sm:$0x1]  ;;  %v928_v14 = vpack.c.bf16 %v699_v11, %v699_v11 }
 0x421   : > { %v1930_v54 = vpop.f32.mrb[13].mxu1  ;;  %v1560_v41 = vsel %vm555_vm9, %v2861_v44, -inf  ;;  %v1404_v53 = vsel %vm393_vm3, %v1403_v23, %v1402_v39  ;;  %v701_v23 = vld [vmem:[%s2610_s13 + $0x11] sm:$0x1]  ;;  %v926_v39 = vpack.c.bf16 %v697_v22, %v697_v22 }
 0x422   : > { %1561 = vmax.xlane.f32.xlu1 %v1560_v41  ;;  %v1557_v43 = vpop.f32.mrb[14].mxu1  ;;  %v1406_v29 = vsel %vm396_vm4, %v1405_v50, %v1404_v53  ;;  %v930_v6 = vpack.c.bf16 %v701_v23, %v701_v23 }
 0x423   : > { %v1931_v20 = vpop.f32.mrb[15].mxu1 }
 0x426   : > { %743 = vadd.xlane.f32.xlu1 %v742_v15 }
 0x42a   : > { %1079 = vadd.xlane.f32.xlu1 %v1078_v10 }
 0x49f   : > { %v890_v18 = vpop.xlane.xlu1 %889 }
 0x4a0   : > { %v891_v28 = vsub.f32 %v2836_v56, %v890_v18  ;;  %v1407_v56 = vrot.slane %v1388_v33, 3  ;;  %v927_v18 = vpack.c.bf16 %v698_v7, %v698_v7 }
 0x4a2   : > { %v892_v13 = vmul.f32 1.442695, %v891_v28  ;;  %v1408_v36 = vsel %vm399_vm5, %v1407_v56, %v1406_v29  ;;  %v700_v28 = vld [vmem:[%s2610_s13 + $0xd] sm:$0x1]  ;;  %v944_v56 = vunpack.c.l.b16 %v928_v14 }
 0x4a3   : > { %v929_v33 = vpack.c.bf16 %v700_v28, %v700_v28 }
 0x4a4   : > { %2030 = vpow2.f32 %v892_v13 }
 0x4a7   : > { %v1226_v21 = vpop.xlane.xlu0 %1225 }
 0x4a8   : > { %v1227_v24 = vsub.f32 %v2840_v32, %v1226_v21  ;;  %v1410_v32 = vsel %vm402_vm6, %v1409_v25, %v1408_v36  ;;  %v702_v21 = vld [vmem:[%s2610_s13 + $0x15] sm:$0x1]  ;;  %v703_v25 = vld [vmem:[%s2610_s13 + $0x19] sm:$0x1] }
 0x4a9   : > { %v1412_v38 = vsel %vm405_vm7, %v1411_v55, %v1410_v32  ;;  %v931_v36 = vpack.c.bf16 %v702_v21, %v702_v21  ;;  %v942_v55 = vunpack.c.l.b16 %v926_v39  ;;  %v945_v32 = vunpack.c.l.b16 %v929_v33 }
 0x4aa   : > { %v1228_v34 = vmul.f32 1.442695, %v1227_v24  ;;  %v1414_v43 = vsel %vm408_vm8, %v1412_v38, 0.0  ;;  %v943_v24 = vunpack.c.l.b16 %v927_v18 }
 0x4ac   : > { %2032 = vpow2.f32 %v1228_v34 }
 0x4ae   : > { %v2904_v58 = vpop.eup %2030 }
 0x4af   : > { %v1562_v54 = vpop.xlane.xlu1 %1561  ;;  %v898_v41 = vsel %vm555_vm9, %v2904_v58, 0.0  ;;  %v2910_v12 = vmul.f32 %v2904_v58, %v2904_v58 }
 0x4b0   : > { %v1563_v3 = vsub.f32 %v2861_v44, %v1562_v54  ;;  %899 = vadd.xlane.f32.xlu1 %v898_v41  ;;  %v704_v54 = vld [vmem:[%s2610_s13 + $0x1d] sm:$0x1]  ;;  %v932_v41 = vpack.c.bf16 %v703_v25, %v703_v25 }
 0x4b1   : > { %v895_v42 = vsel %vm555_vm9, %v2910_v12, 0.0 }
 0x4b2   : > { %v1564_v45 = vmul.f32 1.442695, %v1563_v3  ;;  %v946_v3 = vunpack.c.l.b16 %v930_v6 }
 0x4b3   : > { %v744_v15 = vpop.xlane.xlu1 %743 }
 0x4b4   : > { %2034 = vpow2.f32 %v1564_v45  ;;  %896 = vadd.xlane.f32.xlu1 %v895_v42  ;;  %v749_v51 = vadd.f32 %v1853_v8, %v744_v15 }
 0x4b6   : > { %v2918_v48 = vpop.eup %2032  ;;  %v1854_v57 = vmul.f32 -1.442695, %v749_v51 }
 0x4b7   : > { %v2922_v52 = vmul.f32 %v2918_v48, %v2918_v48  ;;  %v1234_v26 = vsel %vm555_vm9, %v2918_v48, 0.0  ;;  %v1080_v46 = vpop.xlane.xlu1 %1079 }
 0x4b8   : > { %1415 = vadd.xlane.f32.xlu1 %v1414_v43  ;;  %v1085_v59 = vadd.f32 %v1858_v27, %v1080_v46  ;;  %2036 = vpow2.f32 %v1854_v57  ;;  %v933_v43 = vpack.c.bf16 %v704_v54, %v704_v54  ;;  %v954_v27 = vrot.slane %v945_v32, 5  ;;  %v1036_v32 = vld [vmem:[%s2610_s13 + $0xe] sm:$0x1] }
 0x4b9   : > { %v1231_v44 = vsel %vm555_vm9, %v2922_v52, 0.0  ;;  %v956_v46 = vrot.slane %v946_v3, 4 }
 0x4ba   : > { %1232 = vadd.xlane.f32.xlu0 %v1231_v44  ;;  %v1859_v62 = vmul.f32 -1.442695, %v1085_v59  ;;  %v947_v44 = vunpack.c.l.b16 %v931_v36  ;;  %v949_v51 = vunpack.c.l.b16 %v933_v43  ;;  %v1034_v36 = vld [vmem:[%s2610_s13 + $0x6] sm:$0x1]  ;;  %v1265_v43 = vpack.c.bf16 %v1036_v32, %v1036_v32 }
 0x4bb   : > { %v1263_v54 = vpack.c.bf16 %v1034_v36, %v1034_v36  ;;  %v1376_v36 = vld [vmem:[%s2610_s13 + $0x1f] sm:$0x1] }
 0x4bc   : > { %1235 = vadd.xlane.f32.xlu1 %v1234_v26  ;;  %2038 = vpow2.f32 %v1859_v62  ;;  %v948_v26 = vunpack.c.l.b16 %v932_v41  ;;  %v958_v62 = vrot.slane %v947_v44, 3  ;;  %v1033_v41 = vld [vmem:[%s2610_s13 + $0x2] sm:$0x1]  ;;  %v1370_v44 = vld [vmem:[%s2610_s13 + $0x7] sm:$0x1] }
 0x4be   : > { %v2928_v49 = vpop.eup %2034 }
 0x4bf   : > { %v1570_v20 = vsel %vm555_vm9, %v2928_v49, 0.0  ;;  %v2934_v47 = vmul.f32 %v2928_v49, %v2928_v49 }
 0x4c0   : > { %1571 = vadd.xlane.f32.xlu1 %v1570_v20  ;;  %v950_v20 = vrot.slane %v943_v24, 7 }
 0x4c1   : > { %v1567_v37 = vsel %vm555_vm9, %v2934_v47, 0.0 }
 0x4c2   : > { %1568 = vadd.xlane.f32.xlu0 %v1567_v37  ;;  %v2037_v60 = vpop.eup %2036  ;;  %v952_v37 = vrot.slane %v944_v56, 6  ;;  %v951_v59 = vsel %vm387_vm1, %v950_v20, %v942_v55  ;;  %v1035_v55 = vld [vmem:[%s2610_s13 + $0xa] sm:$0x1] }
 0x4c3   : > { %v753_v2 = vadd.f32 1.0, %v2037_v60  ;;  %v1264_v3 = vpack.c.bf16 %v1035_v55, %v1035_v55 }
 0x4c6   : > { %v2039_v63 = vpop.eup %2038 }
 0x4c7   : > { %v1089_v4 = vadd.f32 1.0, %v2039_v63  ;;  %v960_v63 = vrot.slane %v948_v26, 2  ;;  %v1280_v26 = vunpack.c.l.b16 %v1264_v3 }
 0x53d   : > { %v900_v17 = vpop.xlane.xlu1 %899 }
 0x53e   : > { %2040 = vrcp.f32 %v900_v17 }
 0x53f   : > { %2042 = vrcp.f32 %v753_v2 }
 0x541   : > { %v897_v40 = vpop.xlane.xlu1 %896 }
 0x542   : > { %2044 = vrcp.f32 %v897_v40 }
 0x543   : > { %2046 = vrcp.f32 %v1089_v4 }
 0x545   : > { %v1416_v61 = vpop.xlane.xlu1 %1415 }
 0x546   : > { %v1421_v31 = vadd.f32 %v1863_v1, %v1416_v61  ;;  %v962_v1 = vrot.slane %v949_v51, 1  ;;  %v1371_v51 = vld [vmem:[%s2610_s13 + $0xb] sm:$0x1] }
 0x547   : > { %v1233_v10 = vpop.xlane.xlu0 %1232 }
 0x548   : > { %v2041_v19 = vpop.eup %2040  ;;  %v1864_v5 = vmul.f32 -1.442695, %v1421_v31  ;;  %2048 = vrcp.f32 %v1233_v10 }
 0x549   : > { %v906_v16 = vmul.f32 %v2041_v19, %v900_v17  ;;  %v1236_v9 = vpop.xlane.xlu1 %1235  ;;  %v2043_v30 = vpop.eup %2042  ;;  %v953_v17 = vsel %vm390_vm2, %v952_v37, %v951_v59  ;;  %v1288_v59 = vrot.slane %v1280_v26, 6 }
 0x54a   : > { %2050 = vpow2.f32 %v1864_v5  ;;  %v909_v53 = vsub.f32 1.0, %v2043_v30  ;;  %v955_v4 = vsel %vm393_vm3, %v954_v27, %v953_v17  ;;  %v1599_v27 = vpack.c.bf16 %v1370_v44, %v1370_v44  ;;  %v1372_v17 = vld [vmem:[%s2610_s13 + $0xf] sm:$0x1] }
 0x54b   : > { %v907_v13 = vsub.f32 2.0, %v906_v16  ;;  %2052 = vrcp.f32 %v1236_v9  ;;  %v957_v7 = vsel %vm396_vm4, %v956_v46, %v955_v4  ;;  %v1281_v46 = vunpack.c.l.b16 %v1265_v43 }
 0x54c   : > { %v2045_v50 = vpop.eup %2044  ;;  %v959_v11 = vsel %vm399_vm5, %v958_v62, %v957_v7  ;;  %v1039_v62 = vld [vmem:[%s2610_s13 + $0x1a] sm:$0x1]  ;;  %v1373_v7 = vld [vmem:[%s2610_s13 + $0x13] sm:$0x1] }
 0x54d   : > { %v908_v29 = vmul.f32 %v2041_v19, %v907_v13  ;;  %v902_v34 = vmul.f32 %v2045_v50, %v897_v40  ;;  %v1572_v35 = vpop.xlane.xlu1 %1571  ;;  %v2047_v8 = vpop.eup %2046  ;;  %v961_v18 = vsel %vm402_vm6, %v960_v63, %v959_v11  ;;  %v1600_v63 = vpack.c.bf16 %v1371_v51, %v1371_v51 }
 0x54e   : > { %2054 = vrcp.f32 %v1572_v35  ;;  %v1245_v5 = vsub.f32 1.0, %v2047_v8  ;;  %v963_v14 = vsel %vm405_vm7, %v962_v1, %v961_v18  ;;  %v1615_v1 = vunpack.c.l.b16 %v1599_v27 }
 0x54f   : > { %v903_v45 = vsub.f32 2.0, %v902_v34  ;;  %v1569_v38 = vpop.xlane.xlu0 %1568  ;;  %v911_v42 = vmul.f32 %v2043_v30, %v908_v29  ;;  %v964_v23 = vpack.c.b16 %v963_v14, %v963_v14 }
 0x550   : > { %2056 = vrcp.f32 %v1569_v38 }
 0x551   : > { %v904_v15 = vmul.f32 %v2045_v50, %v903_v45  ;;  %920 = vperm.xlu1 %2019, %v911_v42   ;;  %v1262_v45 = vpack.c.bf16 %v1033_v41, %v1033_v41  ;;  %v1037_v42 = vld [vmem:[%s2610_s13 + $0x12] sm:$0x1] }
 0x552   : > { %v2049_v57 = vpop.eup %2048 }
 0x553   : > { %v1238_v60 = vmul.f32 %v2049_v57, %v1233_v10  ;;  %v910_v2 = vmul.f32 %v909_v53, %v904_v15  ;;  %v1278_v20 = vunpack.c.l.b16 %v1262_v45  ;;  %v1266_v15 = vpack.c.bf16 %v1037_v42, %v1037_v42 }
 0x554   : > { %v2051_v40 = vpop.eup %2050 }
 0x555   : > { %v2053_v61 = vpop.eup %2052  ;;  %v1425_v31 = vadd.f32 1.0, %v2051_v40  ;;  %v1239_v19 = vsub.f32 2.0, %v1238_v60  ;;  %914 = vperm.xlu0 %2018, %v910_v2   ;;  %v1282_v40 = vunpack.c.l.b16 %v1266_v15 }
 0x556   : > { %v1242_v16 = vmul.f32 %v2053_v61, %v1236_v9  ;;  %v969_v9 = vsel %vm636_vm10, %v964_v23, 0  ;;  %v1602_v23 = vpack.c.bf16 %v1373_v7, %v1373_v7 }
 0x557   : > { %2058 = vrcp.f32 %v1425_v31  ;;  %v1240_v10 = vmul.f32 %v2049_v57, %v1239_v19  ;;  %1909 = vmatpush3.bf16.msra.mxu0 %v969_v9  ;;  %v1369_v57 = vld [vmem:[%s2610_s13 + $0x3] sm:$0x1]  ;;  %v1040_v31 = vld [vmem:[%s2610_s13 + $0x1e] sm:$0x1]  ;;  %v1268_v19 = vpack.c.bf16 %v1039_v62, %v1039_v62  ;;  %v1292_v18 = vrot.slane %v1282_v40, 4 }
 0x558   : > { %v2055_v22 = vpop.eup %2054  ;;  %v1243_v28 = vsub.f32 2.0, %v1242_v16  ;;  %1920 = vmatprep.subr.bf16.mxu0 %v2243_v0  ;;  %v1598_v4 = vpack.c.bf16 %v1369_v57, %v1369_v57  ;;  %v1601_v16 = vpack.c.bf16 %v1372_v17, %v1372_v17  ;;  %v1269_v14 = vpack.c.bf16 %v1040_v31, %v1040_v31 }
 0x559   : > { %v1578_v30 = vmul.f32 %v2055_v22, %v1572_v35  ;;  %v1246_v13 = vmul.f32 %v1245_v5, %v1240_v10  ;;  %v1616_v10 = vunpack.c.l.b16 %v1600_v63 }
 0x55a   : > { %v2057_v39 = vpop.eup %2056  ;;  %v1244_v33 = vmul.f32 %v2053_v61, %v1243_v28  ;;  %v1290_v61 = vrot.slane %v1281_v46, 5  ;;  %v1622_v28 = vrot.slane %v1615_v1, 7 }
 0x55b   : > { %v1574_v50 = vmul.f32 %v2057_v39, %v1569_v38  ;;  %1250 = vperm.xlu1 %2019, %v1246_v13   ;;  %v1579_v53 = vsub.f32 2.0, %v1578_v30  ;;  %v1279_v38 = vunpack.c.l.b16 %v1263_v54  ;;  %v1374_v13 = vld [vmem:[%s2610_s13 + $0x17] sm:$0x1]  ;;  %v1624_v9 = vrot.slane %v1616_v10, 6 }
 0x55c   : > { %v1247_v21 = vmul.f32 %v2047_v8, %v1244_v33  ;;  %v1038_v8 = vld [vmem:[%s2610_s13 + $0x16] sm:$0x1]  ;;  %v1617_v33 = vunpack.c.l.b16 %v1601_v16 }
 0x55d   : > { %v1575_v6 = vsub.f32 2.0, %v1574_v50  ;;  %v1580_v24 = vmul.f32 %v2055_v22, %v1579_v53  ;;  %v1286_v37 = vrot.slane %v1279_v38, 7  ;;  %v1267_v60 = vpack.c.bf16 %v1038_v8, %v1038_v8 }
 0x55e   : > { %1256 = vperm.xlu0 %2018, %v1247_v21   ;;  %v1614_v22 = vunpack.c.l.b16 %v1598_v4  ;;  %v1375_v21 = vld [vmem:[%s2610_s13 + $0x1b] sm:$0x1]  ;;  %v1605_v38 = vpack.c.bf16 %v1376_v36, %v1376_v36 }
 0x55f   : > { %v1576_v29 = vmul.f32 %v2057_v39, %v1575_v6  ;;  %v1287_v2 = vsel %vm387_vm1, %v1286_v37, %v1278_v20  ;;  %v1283_v11 = vunpack.c.l.b16 %v1267_v60  ;;  %v1284_v39 = vunpack.c.l.b16 %v1268_v19 }
 0x560   : > { %v1289_v5 = vsel %vm390_vm2, %v1288_v59, %v1287_v2  ;;  %v1603_v6 = vpack.c.bf16 %v1374_v13, %v1374_v13  ;;  %v1604_v55 = vpack.c.bf16 %v1375_v21, %v1375_v21  ;;  %v1621_v8 = vunpack.c.l.b16 %v1605_v38 }
 0x561   : > { %v2059_v56 = vpop.eup %2058  ;;  %v1291_v30 = vsel %vm393_vm3, %v1290_v61, %v1289_v5  ;;  %v1294_v50 = vrot.slane %v1283_v11, 3 }
 0x562   : > { %v1583_v34 = vmul.f32 %v2059_v56, %v1580_v24  ;;  %v1581_v35 = vsub.f32 1.0, %v2059_v56  ;;  %v1293_v53 = vsel %vm396_vm4, %v1292_v18, %v1291_v30  ;;  %v1623_v24 = vsel %vm387_vm1, %v1622_v28, %v1614_v22 }
 0x563   : > { %v1285_v56 = vunpack.c.l.b16 %v1269_v14  ;;  %v1625_v54 = vsel %vm390_vm2, %v1624_v9, %v1623_v24  ;;  %v1619_v41 = vunpack.c.l.b16 %v1603_v6  ;;  %v1620_v43 = vunpack.c.l.b16 %v1604_v55 }
 0x564   : > { %1592 = vperm.xlu0 %2018, %v1583_v34   ;;  %v1582_v25 = vmul.f32 %v1581_v35, %v1576_v29  ;;  %v1618_v29 = vunpack.c.l.b16 %v1602_v23  ;;  %v1296_v34 = vrot.slane %v1284_v39, 2  ;;  %v1626_v35 = vrot.slane %v1617_v33, 5 }
 0x565   : > { %v1298_v32 = vrot.slane %v1285_v56, 1  ;;  %v1630_v44 = vrot.slane %v1619_v41, 3  ;;  %v1632_v51 = vrot.slane %v1620_v43, 2  ;;  %v1634_v60 = vrot.slane %v1621_v8, 1 }
 0x566   : > { %1586 = vperm.xlu1 %2019, %v1582_v25   ;;  %v1295_v25 = vsel %vm399_vm5, %v1294_v50, %v1293_v53  ;;  %v1628_v3 = vrot.slane %v1618_v29, 4  ;;  %v1627_v42 = vsel %vm393_vm3, %v1626_v35, %v1625_v54 }
 0x567   : > { %v1297_v45 = vsel %vm402_vm6, %v1296_v34, %v1295_v25 }
 0x568   : > { %v1299_v20 = vsel %vm405_vm7, %v1298_v32, %v1297_v45  ;;  %v1629_v37 = vsel %vm396_vm4, %v1628_v3, %v1627_v42 }
 0x569   : > { %v1300_v57 = vpack.c.b16 %v1299_v20, %v1299_v20  ;;  %v1631_v59 = vsel %vm399_vm5, %v1630_v44, %v1629_v37 }
 0x56a   : > { %v1633_v2 = vsel %vm402_vm6, %v1632_v51, %v1631_v59 }
 0x56b   : > { %v1305_v63 = vsel %vm636_vm10, %v1300_v57, 0  ;;  %v1635_v4 = vsel %vm405_vm7, %v1634_v60, %v1633_v2 }
 0x56c   : > { %v1636_v61 = vpack.c.b16 %v1635_v4, %v1635_v4 }
 0x56e   : > { %v1641_v5 = vsel %vm636_vm10, %v1636_v61, 0 }
 0x5d0   : > { %v921_v26 = vpop.permute.xlu1 %920 }
 0x5d1   : > { %v923_v27 = vmul.f32 %v2904_v58, %v921_v26 }
 0x5d4   : > { %v915_v15 = vpop.permute.xlu0 %914 }
 0x5d5   : > { %v917_v46 = vmul.f32 %v915_v15, %v2910_v12 }
 0x5d7   : > { %v924_v62 = vadd.f32 %v923_v27, %v917_v46 }
 0x5d9   : > { %v925_v17 = vpack.c.bf16 %v924_v62, %v924_v62 }
 0x5da   : > { %v1251_v40 = vpop.permute.xlu1 %1250 }
 0x5db   : > { %1911 = vmatmul.mubr.msk.bf16.vlgmr.msra.gmra.mrb[4].mxu0 %vm555_vm9, %v925_v17  ;;  %v1253_v12 = vmul.f32 %v1251_v40, %v2922_v52 }
 0x5dc   : > { %1921 = vmatpush3.bf16.msra.mxu0 %v1305_v63  ;;  %1922 = vmatprep.mubr.msk.bf16.mxu0 %vm2244_vm0, %v2243_v0 }
 0x5dd   : > { %v1257_v58 = vpop.permute.xlu0 %1256  ;;  %1932 = vmatprep.subr.bf16.mxu0 %v2243_v0 }
 0x5de   : > { %v1259_v1 = vmul.f32 %v2918_v48, %v1257_v58 }
 0x5e0   : > { %v1260_v31 = vadd.f32 %v1259_v1, %v1253_v12 }
 0x5e2   : > { %v1261_v19 = vpack.c.bf16 %v1260_v31, %v1260_v31 }
 0x5e3   : > { %v1593_v7 = vpop.permute.xlu0 %1592 }
 0x5e4   : > { %1923 = vmatmul.mubr.msk.bf16.vlgmr.msra.gmra.mrb[8].mxu0 %vm555_vm9, %v1261_v19  ;;  %v1595_v11 = vmul.f32 %v2928_v49, %v1593_v7 }
 0x5e5   : > { %1933 = vmatpush3.bf16.msra.mxu0 %v1641_v5  ;;  %v1587_v16 = vpop.permute.xlu1 %1586  ;;  %1934 = vmatprep.mubr.msk.bf16.mxu0 %vm2244_vm0, %v2243_v0 }
 0x5e6   : > { %v1589_v10 = vmul.f32 %v1587_v16, %v2934_v47 }
 0x5e8   : > { %v1596_v52 = vadd.f32 %v1595_v11, %v1589_v10 }
 0x5ea   : > { %v1597_v18 = vpack.c.bf16 %v1596_v52, %v1596_v52 }
 0x5ec   : > { %1935 = vmatmul.mubr.msk.bf16.vlgmr.msra.gmra.mrb[12].mxu0 %vm555_vm9, %v1597_v18 }
 0x6ae   : > { %v1005_v48 = vpop.f32.mrb[4].mxu0 }
 0x6af   : > { %1012 = vrot.lane.b32.xlu1 %v1005_v48, %s2246_s17  ;;  %v1912_v22 = vpop.f32.mrb[5].mxu0 }
 0x6b0   : > { %v1008_v28 = vpop.f32.mrb[6].mxu0 }
 0x6b1   : > { %v1913_v14 = vpop.f32.mrb[7].mxu0 }
 0x6b7   : > { %v1341_v30 = vpop.f32.mrb[8].mxu0 }
 0x6b8   : > { %1348 = vrot.lane.b32.xlu0 %v1341_v30, %s2247_s24  ;;  %v1924_v0 = vpop.f32.mrb[9].mxu0 }
 0x6b9   : > { %v1344_v49 = vpop.f32.mrb[10].mxu0 }
 0x6ba   : > { %v1925_v47 = vpop.f32.mrb[11].mxu0 }
 0x6bf   : > { %v1677_v13 = vpop.f32.mrb[12].mxu0 }
 0x6c0   : > { %1684 = vrot.lane.b32.xlu1 %v1677_v13, %s2248_s30  ;;  %v1936_v23 = vpop.f32.mrb[13].mxu0 }
 0x6c1   : > { %v1680_v39 = vpop.f32.mrb[14].mxu0 }
 0x6c2   : > { %v1937_v33 = vpop.f32.mrb[15].mxu0 }
 0x721   : > { %v1013_v50 = vpop.permute.xlu1 %1012 }
 0x722   : > { %1016 = vst.msk [vmem:[%s2832_s11] sm:$0xff] %vm1015_vm11, %v1013_v50 }
 0x72a   : > { %v1349_v9 = vpop.permute.xlu0 %1348 }
 0x72b   : > { %1352 = vst.msk [vmem:[%s2832_s11] sm:$0xff] %vm1351_vm12, %v1349_v9 }
 0x732   : > { %v1685_v53 = vpop.permute.xlu1 %1684 }
 0x733   : > { %1688 = vst.msk [vmem:[%s2832_s11] sm:$0xff] %vm1687_vm13, %v1685_v53 }
 0x734   : > { %2163 = shalt.err (!%p2160_p13)
}
 0x735   : > { %s2164_s29 = scalar_lea.hbm %s3017_s28, 128  ;;  %s2168_s15 = scalar_lea.hbm %s3072_s5, 256 }
 0x736   : > { %p2165_p11 = scmp.ne.s32.totalorder %s3017_s28, %s2164_s29  ;;  %p2169_p7 = scmp.lt.u32.totalorder %s3017_s28, %s3072_s5 }
 0x737   : > { %p2170_p4 = scmp.lt.u32.totalorder %s2168_s15, %s2164_s29  ;;  %p2172_p0 = scmp.lt.u32.totalorder %s2164_s29, %s3017_s28 }
 0x738   : > { %p2166_p2 = pnand %p2165_p11, %p3106_p10 }
 0x739   : > { %p2171_p3 = por %p2170_p4, %p2169_p7 }
 0x73a   : > { %p2167_p5 = pneg %p2166_p2 }
 0x73b   : > { %p2173_p8 = por %p2172_p0, %p2171_p3 }
 0x73d   : > { %p2174_p9 = pnand %p2173_p8, %p2167_p5 }
 0x73f   : > { %2177 = shalt.err (!%p2174_p9)
}
 0x740   : > { %1944 = dma.vmem_to_hbm [thread:$0]  (%p3106_p10), %s3019_s7, 128, %s3017_s28, %s1690_s16  }
 0x741 PF: > { %s3107_s14 = sld [smem:[#allocation16_spill]]  ;;  %s3108_s27 = sld [smem:[#allocation13_spill]] }
 0x742   : > { %s1716_s9 = sand.u32 1, %s2216_s18  }
 0x743   : > { %s1717_s17 = scalar_lea.sflag [#allocation4], %s1716_s9 }
 0x747   : > { %p3109_p12 = scmp.ne.s32.totalorder %s3107_s14, 0  ;;  %p3110_p1 = scmp.ge.s32.totalorder %s3108_s27, 2 }
 0x749   : > { %p1957_p6 = pnand %p3110_p1, %p3109_p12 }
 0x74b   : > { %2211 = dma.done.wait (!%p1957_p6), %s1717_s17, 128  }
 0x74c   : > { %2213 = vsyncadd (!%p1957_p6), %s1717_s17, 4294967168  ;;  %s24_s23 = sadd.s32 1, %s3108_s27   ;;  %s3111_s6 = sld [smem:[#allocation15_spill]] }
 0x74d   : > { %p21_p13 = scmp.ge.s32.totalorder %s24_s23, 4   ;;  %s3112_s21 = sld [smem:[#allocation12_spill]] }
 0x74e   : > { %s3113_s22 = sld [smem:[#allocation14_spill]]  ;;  %s3114_s18 = smov %s2220_s19 }
 0x74f   : > { %s3115_s19 = smov %s2224_s20  ;;  %23 = sbr.rel (!%p21_p13) target bundleno = 10 (0xa), region = 109 }
 0x752   : > { %s3116_s20 = smov %s3111_s6 }
 0x756   :  { %1722 = vsyncpa [#allocation3], 1 }
 0x757   :  { %1724 = vsyncpa [#allocation3 + $0x1], 1 }
 0x758   :  { %1725 = vsyncpa [#allocation6], 1 }
 0x759   :  { %1727 = vsyncpa [#allocation6 + $0x1], 1 }
 0x75a   :  { %1728 = vsyncpa [#allocation4], 1 }
 0x75b   :  { %1730 = vsyncpa [#allocation4 + $0x1], 1 }

</bundles_post_ra>
